<compile_context>
chip_gen: v6e
topology: v6e:2x2x1
jax: 0.10.0
libtpu: 0.0.40
codegen_flags: <defaults>
</compile_context>

<pallas_src>
import math

import jax
import jax.numpy as jnp
from jax.experimental import pallas as pl
from jax.experimental.pallas import tpu as pltpu

# ----- small synthetic config (DistilBERT structure, tiny sizes) -----
VOCAB = 100
HIDDEN = 32          # config.hidden_size
N_HEADS = 4          # config.num_attention_heads
D_HEAD = HIDDEN // N_HEADS
FFN = 64             # config.intermediate_size
N_LAYERS = 2         # config.num_hidden_layers
N_LABELS = 6         # config.num_labels
MAX_POS = 16
LN_EPS = 1e-12
BATCH = 2
SEQ = 8
LANE = 128           # lane-padding width for packed vectors / logits


# ---------------------------------------------------------------------------
# Fused whole-model Pallas kernel.
#   grid = (N_LAYERS,); one grid step = one transformer layer applied to the
#   whole batch's (B*S, H) hidden state, resident in VMEM scratch.
# ---------------------------------------------------------------------------
def _model_kernel(h_emb_ref, bias_ref, const_ref,
                  wqkv_ref, wo_ref, w1_ref, w2_ref, vec_ref,
                  wpre_ref, wcls_ref,
                  logits_ref, h_sc, ctx_sc):
    layer = pl.program_id(0)

    def ln(x, g, b):                              # f32 LayerNorm statistics
        mean = jnp.mean(x, axis=-1, keepdims=True)
        var = jnp.mean((x - mean) ** 2, axis=-1, keepdims=True)
        return (x - mean) * jax.lax.rsqrt(var + LN_EPS) * g + b

    # --- layer 0: embedding LayerNorm (dropout = identity in eval mode) ---
    @pl.when(layer == 0)
    def _():
        h_sc[...] = ln(h_emb_ref[...],
                       const_ref[0:1, 0:HIDDEN], const_ref[1:2, 0:HIDDEN])

    x = h_sc[...]                                 # (B*S, H) f32 residual stream
    vecs = vec_ref[0]                             # (8, 128) packed per-layer vectors

    # --- fused QKV projection: one (B*S, H) x (H, 3H) bf16 MXU pass ---
    qkv = jnp.dot(x.astype(jnp.bfloat16), wqkv_ref[0],
                  preferred_element_type=jnp.float32) + vecs[0:1, 0:3 * HIDDEN]
    scale = 1.0 / math.sqrt(D_HEAD)
    q = qkv[:, 0:HIDDEN] * scale
    k = qkv[:, HIDDEN:2 * HIDDEN]
    v = qkv[:, 2 * HIDDEN:3 * HIDDEN]

    bias = bias_ref[...]                          # (B*S, B*S) block-diag + padding bias

    # --- per-head attention on the packed batch slab; contexts written straight
    #     into a VMEM scratch at their lane offset (no concatenate) ---
    for h in range(N_HEADS):
        lo, hi = h * D_HEAD, (h + 1) * D_HEAD
        qh = q[:, lo:hi].astype(jnp.bfloat16)
        kh = k[:, lo:hi].astype(jnp.bfloat16)
        vh = v[:, lo:hi].astype(jnp.bfloat16)
        scores = jax.lax.dot_general(             # q @ k^T : (B*S, B*S), f32
            qh, kh, (((1,), (1,)), ((), ())),
            preferred_element_type=jnp.float32)
        scores = scores + bias                    # cross-batch / padded keys -> -1e9
        scores = scores - jnp.max(scores, axis=-1, keepdims=True)
        p = jnp.exp(scores)
        p = p / jnp.sum(p, axis=-1, keepdims=True)        # exact softmax (parity)
        ctx_sc[:, lo:hi] = jnp.dot(p.astype(jnp.bfloat16), vh,
                                   preferred_element_type=jnp.float32)

    ctx = ctx_sc[...]                             # (B*S, H) f32

    # --- output projection + residual + sa_layer_norm ---
    attn_out = jnp.dot(ctx.astype(jnp.bfloat16), wo_ref[0],
                       preferred_element_type=jnp.float32) + vecs[1:2, 0:HIDDEN]
    h1 = ln(x + attn_out, vecs[2:3, 0:HIDDEN], vecs[3:4, 0:HIDDEN])

    # --- FFN: lin1 -> exact (erf) GELU -> lin2, residual, output_layer_norm ---
    ff = jnp.dot(h1.astype(jnp.bfloat16), w1_ref[0],
                 preferred_element_type=jnp.float32) + vecs[4:5, 0:FFN]
    ff = 0.5 * ff * (1.0 + jax.lax.erf(ff * (1.0 / math.sqrt(2.0))))
    ff = jnp.dot(ff.astype(jnp.bfloat16), w2_ref[0],
                 preferred_element_type=jnp.float32) + vecs[5:6, 0:HIDDEN]
    h2 = ln(h1 + ff, vecs[6:7, 0:HIDDEN], vecs[7:8, 0:HIDDEN])

    h_sc[...] = h2                                # carry to next layer step

    # --- classification head, fused into the last layer step.
    #     Computed per-token into a lane-dense (B*S, 128) slab; the CLS rows and
    #     the first N_LABELS lanes are sliced out in JAX. ---
    @pl.when(layer == pl.num_programs(0) - 1)
    def _():
        pooled = jnp.dot(h2.astype(jnp.bfloat16), wpre_ref[...],
                         preferred_element_type=jnp.float32) + const_ref[2:3, 0:HIDDEN]
        pooled = jnp.maximum(pooled, 0.0)         # ReLU; dropout = identity
        logits = jnp.dot(pooled.astype(jnp.bfloat16), wcls_ref[...],
                         preferred_element_type=jnp.float32) + const_ref[3:4, :]
        logits_ref[...] = logits.astype(logits_ref.dtype)


# ---------------------------------------------------------------------------
# Parameter construction (deterministic, synthetic)
# ---------------------------------------------------------------------------
def init_params(key):
    def nrm(k, shape, scale=0.02):
        return (scale * jax.random.normal(k, shape)).astype(jnp.float32)

    keys = jax.random.split(key, 3 + N_LAYERS)
    params = {
        "word_emb": nrm(keys[0], (VOCAB, HIDDEN)),
        "pos_emb": nrm(keys[1], (MAX_POS, HIDDEN)),
        "emb_ln_g": jnp.ones((HIDDEN,), jnp.float32),
        "emb_ln_b": jnp.zeros((HIDDEN,), jnp.float32),
        "layers": [],
    }
    for li in range(N_LAYERS):
        lk = jax.random.split(keys[2 + li], 6)
        params["layers"].append({
            "wq": nrm(lk[0], (HIDDEN, HIDDEN)), "bq": jnp.zeros((HIDDEN,), jnp.float32),
            "wk": nrm(lk[1], (HIDDEN, HIDDEN)), "bk": jnp.zeros((HIDDEN,), jnp.float32),
            "wv": nrm(lk[2], (HIDDEN, HIDDEN)), "bv": jnp.zeros((HIDDEN,), jnp.float32),
            "wo": nrm(lk[3], (HIDDEN, HIDDEN)), "bo": jnp.zeros((HIDDEN,), jnp.float32),
            "ln1_g": jnp.ones((HIDDEN,), jnp.float32), "ln1_b": jnp.zeros((HIDDEN,), jnp.float32),
            "w1": nrm(lk[4], (HIDDEN, FFN)), "b1": jnp.zeros((FFN,), jnp.float32),
            "w2": nrm(lk[5], (FFN, HIDDEN)), "b2": jnp.zeros((HIDDEN,), jnp.float32),
            "ln2_g": jnp.ones((HIDDEN,), jnp.float32), "ln2_b": jnp.zeros((HIDDEN,), jnp.float32),
        })
    hk = jax.random.split(keys[2 + N_LAYERS], 2)
    params["w_pre"] = nrm(hk[0], (HIDDEN, HIDDEN))
    params["b_pre"] = jnp.zeros((HIDDEN,), jnp.float32)
    params["w_cls"] = nrm(hk[1], (HIDDEN, N_LABELS))   # stand-in for xavier_normal_
    params["b_cls"] = jnp.zeros((N_LABELS,), jnp.float32)
    return params


# ---------------------------------------------------------------------------
# One-time parameter preprocessing (hoisted OUT of the jitted forward):
#   fuse Wq/Wk/Wv, stack per-layer weights, cast matmul weights to bf16,
#   pack the small per-layer vectors into one (L, 8, 128) slab.
# ---------------------------------------------------------------------------
def prepare_params(params):
    layers = params["layers"]
    bf16 = jnp.bfloat16

    def pad_row(v):
        v = v.astype(jnp.float32)
        return jnp.pad(v, (0, LANE - v.shape[0]))

    wqkv = jnp.stack([jnp.concatenate([ly["wq"], ly["wk"], ly["wv"]], axis=1)
                      for ly in layers]).astype(bf16)                  # (L, H, 3H)
    wo = jnp.stack([ly["wo"] for ly in layers]).astype(bf16)           # (L, H, H)
    w1 = jnp.stack([ly["w1"] for ly in layers]).astype(bf16)           # (L, H, FFN)
    w2 = jnp.stack([ly["w2"] for ly in layers]).astype(bf16)           # (L, FFN, H)

    layer_vecs = jnp.stack([                                           # (L, 8, 128) f32
        jnp.stack([
            pad_row(jnp.concatenate([ly["bq"], ly["bk"], ly["bv"]])),  # row 0: bqkv
            pad_row(ly["bo"]),                                         # row 1
            pad_row(ly["ln1_g"]), pad_row(ly["ln1_b"]),                # rows 2,3
            pad_row(ly["b1"]), pad_row(ly["b2"]),                      # rows 4,5
            pad_row(ly["ln2_g"]), pad_row(ly["ln2_b"]),                # rows 6,7
        ]) for ly in layers])

    const_vecs = jnp.stack([                                           # (4, 128) f32
        pad_row(params["emb_ln_g"]), pad_row(params["emb_ln_b"]),
        pad_row(params["b_pre"]), pad_row(params["b_cls"]),
    ])

    w_pre = params["w_pre"].astype(bf16)                               # (H, H)
    w_cls = jnp.pad(params["w_cls"],                                   # (H, 128) lane-padded
                    ((0, 0), (0, LANE - N_LABELS))).astype(bf16)

    return {
        "word_emb": params["word_emb"], "pos_emb": params["pos_emb"],
        "wqkv": wqkv, "wo": wo, "w1": w1, "w2": w2,
        "layer_vecs": layer_vecs, "const_vecs": const_vecs,
        "w_pre": w_pre, "w_cls": w_cls,
    }


# ---------------------------------------------------------------------------
# Forward pass (DistilBertModel + sequence-classification head)
# ---------------------------------------------------------------------------
def forward(prep, input_ids, attention_mask):
    B, S = input_ids.shape
    BS = B * S

    # --- embeddings: word + position (gather stays in JAX), packed to (B*S, H) ---
    positions = jnp.arange(S)
    h_emb = prep["word_emb"][input_ids] + prep["pos_emb"][positions][None, :, :]
    h_emb = h_emb.astype(jnp.float32).reshape(BS, HIDDEN)

    # --- additive attention bias on the packed batch slab:
    #     -1e9 for cross-batch pairs and for padded keys, else 0.  This makes
    #     attention on the (B*S, B*S) score matrix exactly equal to per-batch
    #     masked attention (cross terms underflow to 0 after softmax). ---
    batch_ids = jnp.repeat(jnp.arange(B), S)                           # (BS,)
    same_batch = batch_ids[:, None] == batch_ids[None, :]
    key_valid = attention_mask.reshape(BS) > 0
    attn_bias = jnp.where(same_batch & key_valid[None, :],
                          0.0, -1e9).astype(jnp.float32)               # (BS, BS)

    def whole(arr):                    # constant blocks, resident across all layers
        return pl.BlockSpec(arr.shape, lambda l: (0,) * arr.ndim)

    def per_layer(arr):                # stacked (L, ...) weights, one DMA per layer
        return pl.BlockSpec((1,) + arr.shape[1:], lambda l: (l, 0, 0))

    out = pl.pallas_call(
        _model_kernel,
        out_shape=jax.ShapeDtypeStruct((BS, LANE), jnp.float32),
        grid=(N_LAYERS,),
        in_specs=[
            whole(h_emb),                        # (BS, H)
            whole(attn_bias),                    # (BS, BS)
            whole(prep["const_vecs"]),           # (4, 128)
            per_layer(prep["wqkv"]),             # (1, H, 3H)
            per_layer(prep["wo"]),               # (1, H, H)
            per_layer(prep["w1"]),               # (1, H, FFN)
            per_layer(prep["w2"]),               # (1, FFN, H)
            per_layer(prep["layer_vecs"]),       # (1, 8, 128)
            whole(prep["w_pre"]),                # (H, H)
            whole(prep["w_cls"]),                # (H, 128)
        ],
        out_specs=pl.BlockSpec((BS, LANE), lambda l: (0, 0)),
        scratch_shapes=[pltpu.VMEM((BS, HIDDEN), jnp.float32),   # resident hidden state
                        pltpu.VMEM((BS, HIDDEN), jnp.float32)],  # per-head context slab
        compiler_params=pltpu.CompilerParams(
            dimension_semantics=("arbitrary",),          # layer carry axis
            vmem_limit_bytes=64 * 1024 * 1024),
    )(h_emb, attn_bias, prep["const_vecs"],
      prep["wqkv"], prep["wo"], prep["w1"], prep["w2"], prep["layer_vecs"],
      prep["w_pre"], prep["w_cls"])

    # CLS token of each batch element, first N_LABELS lanes of the padded logits
    return out.reshape(B, S, LANE)[:, 0, :N_LABELS]                    # (B, num_labels)


if __name__ == "__main__":
    key = jax.random.PRNGKey(0)
    pkey, ikey = jax.random.split(key)
    params = init_params(pkey)
    prep = prepare_params(params)        # one-time weight packing, outside jit

    input_ids = jax.random.randint(ikey, (BATCH, SEQ), 0, VOCAB, dtype=jnp.int32)
    attention_mask = jnp.ones((BATCH, SEQ), dtype=jnp.float32)
    # make the last two positions of example 1 padded, to exercise masking
    attention_mask = attention_mask.at[1, -2:].set(0.0)

    logits = jax.jit(forward)(prep, input_ids, attention_mask)
    logits = jax.block_until_ready(logits)
    assert logits.shape == (BATCH, N_LABELS)
    assert bool(jnp.all(jnp.isfinite(logits)))
    print("KERNEL_OK")
</pallas_src>

<mosaic_0001>
module attributes {stable_mosaic.version = 11 : i64} {
  func.func @_model_kernel(%arg0: i32, %arg1: memref<16x32xf32, #tpu.memory_space<vmem>>, %arg2: memref<16x16xf32, #tpu.memory_space<vmem>>, %arg3: memref<4x128xf32, #tpu.memory_space<vmem>>, %arg4: memref<1x32x96xbf16, #tpu.memory_space<vmem>>, %arg5: memref<1x32x32xbf16, #tpu.memory_space<vmem>>, %arg6: memref<1x32x64xbf16, #tpu.memory_space<vmem>>, %arg7: memref<1x64x32xbf16, #tpu.memory_space<vmem>>, %arg8: memref<1x8x128xf32, #tpu.memory_space<vmem>>, %arg9: memref<32x32xbf16, #tpu.memory_space<vmem>>, %arg10: memref<32x128xbf16, #tpu.memory_space<vmem>>, %arg11: memref<16x128xf32, #tpu.memory_space<vmem>>, %arg12: memref<16x32xf32, #tpu.memory_space<vmem>>, %arg13: memref<16x32xf32, #tpu.memory_space<vmem>>) attributes {dimension_semantics = [#tpu.dimension_semantics<arbitrary>], iteration_bounds = array<i64: 2>, scalar_prefetch = 0 : i64, scratch_operands = 2 : i64, tpu.core_type = #tpu.core_type<tc>, window_params = [{pipeline_mode = #tpu.pipeline_mode<synchronous>, transform_indices = @transform_0, window_bounds = array<i64: 16, 32>}, {pipeline_mode = #tpu.pipeline_mode<synchronous>, transform_indices = @transform_1, window_bounds = array<i64: 16, 16>}, {pipeline_mode = #tpu.pipeline_mode<synchronous>, transform_indices = @transform_2, window_bounds = array<i64: 4, 128>}, {transform_indices = @transform_3, window_bounds = array<i64: 1, 32, 96>}, {transform_indices = @transform_4, window_bounds = array<i64: 1, 32, 32>}, {transform_indices = @transform_5, window_bounds = array<i64: 1, 32, 64>}, {transform_indices = @transform_6, window_bounds = array<i64: 1, 64, 32>}, {transform_indices = @transform_7, window_bounds = array<i64: 1, 8, 128>}, {pipeline_mode = #tpu.pipeline_mode<synchronous>, transform_indices = @transform_8, window_bounds = array<i64: 32, 32>}, {pipeline_mode = #tpu.pipeline_mode<synchronous>, transform_indices = @transform_9, window_bounds = array<i64: 32, 128>}, {pipeline_mode = #tpu.pipeline_mode<synchronous>, transform_indices = @transform_10, window_bounds = array<i64: 16, 128>}]} {
    %c0_i32 = arith.constant 0 : i32
    %0 = arith.cmpi eq, %arg0, %c0_i32 : i32
    %1 = arith.extui %0 : i1 to i32
    %c0_i32_0 = arith.constant 0 : i32
    %2 = arith.cmpi ne, %1, %c0_i32_0 : i32
    scf.if %2 {
      %c0_62 = arith.constant 0 : index
      %c0_63 = arith.constant 0 : index
      %183 = vector.load %arg1[%c0_62, %c0_63] : memref<16x32xf32, #tpu.memory_space<vmem>>, vector<16x32xf32>
      %c0_64 = arith.constant 0 : index
      %c0_65 = arith.constant 0 : index
      %184 = vector.load %arg3[%c0_64, %c0_65] : memref<4x128xf32, #tpu.memory_space<vmem>>, vector<1x32xf32>
      %c1 = arith.constant 1 : index
      %c0_66 = arith.constant 0 : index
      %185 = vector.load %arg3[%c1, %c0_66] : memref<4x128xf32, #tpu.memory_space<vmem>>, vector<1x32xf32>
      %cst_67 = arith.constant dense<0.000000e+00> : vector<16xf32>
      %186 = vector.multi_reduction <add>, %183, %cst_67 [1] : vector<16x32xf32> to vector<16xf32>
      %187 = vector.shape_cast %186 : vector<16xf32> to vector<16x1xf32>
      %cst_68 = arith.constant 3.200000e+01 : f32
      %188 = vector.broadcast %cst_68 : f32 to vector<16x1xf32>
      %189 = arith.divf %187, %188 : vector<16x1xf32>
      %190 = vector.broadcast %189 : vector<16x1xf32> to vector<16x32xf32>
      %191 = arith.subf %183, %190 : vector<16x32xf32>
      %192 = arith.mulf %191, %191 : vector<16x32xf32>
      %cst_69 = arith.constant dense<0.000000e+00> : vector<16xf32>
      %193 = vector.multi_reduction <add>, %192, %cst_69 [1] : vector<16x32xf32> to vector<16xf32>
      %194 = vector.shape_cast %193 : vector<16xf32> to vector<16x1xf32>
      %cst_70 = arith.constant 3.200000e+01 : f32
      %195 = vector.broadcast %cst_70 : f32 to vector<16x1xf32>
      %196 = arith.divf %194, %195 : vector<16x1xf32>
      %197 = vector.broadcast %189 : vector<16x1xf32> to vector<16x32xf32>
      %198 = arith.subf %183, %197 : vector<16x32xf32>
      %cst_71 = arith.constant 9.99999996E-13 : f32
      %199 = vector.broadcast %cst_71 : f32 to vector<16x1xf32>
      %200 = arith.addf %196, %199 : vector<16x1xf32>
      %201 = math.rsqrt %200 : vector<16x1xf32>
      %202 = vector.broadcast %201 : vector<16x1xf32> to vector<16x32xf32>
      %203 = arith.mulf %198, %202 : vector<16x32xf32>
      %204 = vector.broadcast %184 : vector<1x32xf32> to vector<16x32xf32>
      %205 = arith.mulf %203, %204 : vector<16x32xf32>
      %206 = vector.broadcast %185 : vector<1x32xf32> to vector<16x32xf32>
      %207 = arith.addf %205, %206 : vector<16x32xf32>
      %c0_72 = arith.constant 0 : index
      %c0_73 = arith.constant 0 : index
      %208 = vector.load %arg12[%c0_72, %c0_73] : memref<16x32xf32, #tpu.memory_space<vmem>>, vector<16x32xf32>
      tpu.vector_store %arg12[%c0_72, %c0_73], %207 {strides = array<i32>} : memref<16x32xf32, #tpu.memory_space<vmem>>, vector<16x32xf32>,
    } else {
    }
    %c0 = arith.constant 0 : index
    %c0_1 = arith.constant 0 : index
    %3 = vector.load %arg12[%c0, %c0_1] : memref<16x32xf32, #tpu.memory_space<vmem>>, vector<16x32xf32>
    %c0_2 = arith.constant 0 : index
    %c0_3 = arith.constant 0 : index
    %c0_4 = arith.constant 0 : index
    %4 = vector.load %arg8[%c0_2, %c0_3, %c0_4] : memref<1x8x128xf32, #tpu.memory_space<vmem>>, vector<1x8x128xf32>
    %5 = vector.shape_cast %4 : vector<1x8x128xf32> to vector<8x128xf32>
    %6 = arith.truncf %3 : vector<16x32xf32> to vector<16x32xbf16>
    %c0_5 = arith.constant 0 : index
    %c0_6 = arith.constant 0 : index
    %c0_7 = arith.constant 0 : index
    %7 = vector.load %arg4[%c0_5, %c0_6, %c0_7] : memref<1x32x96xbf16, #tpu.memory_space<vmem>>, vector<1x32x96xbf16>
    %8 = vector.shape_cast %7 : vector<1x32x96xbf16> to vector<32x96xbf16>
    %cst = arith.constant dense<0.000000e+00> : vector<16x96xf32>
    %9 = tpu.matmul %6, %8, %cst {dimension_numbers = #tpu.dot_dimension_numbers<[1], [0], [0], [1], [0, 0, 1, 1], [], []>} : vector<16x32xbf16>, vector<32x96xbf16>, vector<16x96xf32> -> vector<16x96xf32>
    %10 = vector.extract_strided_slice %5 {offsets = [0, 0], sizes = [1, 96], strides = [1, 1]} : vector<8x128xf32> to vector<1x96xf32>
    %11 = vector.broadcast %10 : vector<1x96xf32> to vector<16x96xf32>
    %12 = arith.addf %9, %11 : vector<16x96xf32>
    %13 = vector.extract_strided_slice %12 {offsets = [0, 0], sizes = [16, 32], strides = [1, 1]} : vector<16x96xf32> to vector<16x32xf32>
    %cst_8 = arith.constant 0.353553385 : f32
    %14 = vector.broadcast %cst_8 : f32 to vector<16x32xf32>
    %15 = arith.mulf %13, %14 : vector<16x32xf32>
    %16 = vector.extract_strided_slice %12 {offsets = [0, 32], sizes = [16, 32], strides = [1, 1]} : vector<16x96xf32> to vector<16x32xf32>
    %17 = vector.extract_strided_slice %12 {offsets = [0, 64], sizes = [16, 32], strides = [1, 1]} : vector<16x96xf32> to vector<16x32xf32>
    %c0_9 = arith.constant 0 : index
    %c0_10 = arith.constant 0 : index
    %18 = vector.load %arg2[%c0_9, %c0_10] : memref<16x16xf32, #tpu.memory_space<vmem>>, vector<16x16xf32>
    %19 = vector.extract_strided_slice %15 {offsets = [0, 0], sizes = [16, 8], strides = [1, 1]} : vector<16x32xf32> to vector<16x8xf32>
    %20 = arith.truncf %19 : vector<16x8xf32> to vector<16x8xbf16>
    %21 = vector.extract_strided_slice %16 {offsets = [0, 0], sizes = [16, 8], strides = [1, 1]} : vector<16x32xf32> to vector<16x8xf32>
    %22 = arith.truncf %21 : vector<16x8xf32> to vector<16x8xbf16>
    %23 = vector.extract_strided_slice %17 {offsets = [0, 0], sizes = [16, 8], strides = [1, 1]} : vector<16x32xf32> to vector<16x8xf32>
    %24 = arith.truncf %23 : vector<16x8xf32> to vector<16x8xbf16>
    %cst_11 = arith.constant dense<0.000000e+00> : vector<16x16xf32>
    %25 = tpu.matmul %20, %22, %cst_11 {dimension_numbers = #tpu.dot_dimension_numbers<[1], [1], [0], [0], [0, 0, 1, 0], [], []>} : vector<16x8xbf16>, vector<16x8xbf16>, vector<16x16xf32> -> vector<16x16xf32>
    %26 = arith.addf %25, %18 : vector<16x16xf32>
    %cst_12 = arith.constant dense<0xFF800000> : vector<16xf32>
    %27 = vector.multi_reduction <maximumf>, %26, %cst_12 [1] : vector<16x16xf32> to vector<16xf32>
    %28 = vector.shape_cast %27 : vector<16xf32> to vector<16x1xf32>
    %29 = vector.broadcast %28 : vector<16x1xf32> to vector<16x16xf32>
    %30 = arith.subf %26, %29 : vector<16x16xf32>
    %31 = math.exp %30 : vector<16x16xf32>
    %cst_13 = arith.constant dense<0.000000e+00> : vector<16xf32>
    %32 = vector.multi_reduction <add>, %31, %cst_13 [1] : vector<16x16xf32> to vector<16xf32>
    %33 = vector.shape_cast %32 : vector<16xf32> to vector<16x1xf32>
    %34 = vector.broadcast %33 : vector<16x1xf32> to vector<16x16xf32>
    %35 = arith.divf %31, %34 : vector<16x16xf32>
    %36 = arith.truncf %35 : vector<16x16xf32> to vector<16x16xbf16>
    %cst_14 = arith.constant dense<0.000000e+00> : vector<16x8xf32>
    %37 = tpu.matmul %36, %24, %cst_14 {dimension_numbers = #tpu.dot_dimension_numbers<[1], [0], [0], [1], [0, 0, 1, 1], [], []>} : vector<16x16xbf16>, vector<16x8xbf16>, vector<16x8xf32> -> vector<16x8xf32>
    %c0_15 = arith.constant 0 : index
    %c0_16 = arith.constant 0 : index
    %38 = vector.load %arg13[%c0_15, %c0_16] : memref<16x32xf32, #tpu.memory_space<vmem>>, vector<16x8xf32>
    tpu.vector_store %arg13[%c0_15, %c0_16], %37 {strides = array<i32>} : memref<16x32xf32, #tpu.memory_space<vmem>>, vector<16x8xf32>,
    %39 = vector.extract_strided_slice %15 {offsets = [0, 8], sizes = [16, 8], strides = [1, 1]} : vector<16x32xf32> to vector<16x8xf32>
    %40 = arith.truncf %39 : vector<16x8xf32> to vector<16x8xbf16>
    %41 = vector.extract_strided_slice %16 {offsets = [0, 8], sizes = [16, 8], strides = [1, 1]} : vector<16x32xf32> to vector<16x8xf32>
    %42 = arith.truncf %41 : vector<16x8xf32> to vector<16x8xbf16>
    %43 = vector.extract_strided_slice %17 {offsets = [0, 8], sizes = [16, 8], strides = [1, 1]} : vector<16x32xf32> to vector<16x8xf32>
    %44 = arith.truncf %43 : vector<16x8xf32> to vector<16x8xbf16>
    %cst_17 = arith.constant dense<0.000000e+00> : vector<16x16xf32>
    %45 = tpu.matmul %40, %42, %cst_17 {dimension_numbers = #tpu.dot_dimension_numbers<[1], [1], [0], [0], [0, 0, 1, 0], [], []>} : vector<16x8xbf16>, vector<16x8xbf16>, vector<16x16xf32> -> vector<16x16xf32>
    %46 = arith.addf %45, %18 : vector<16x16xf32>
    %cst_18 = arith.constant dense<0xFF800000> : vector<16xf32>
    %47 = vector.multi_reduction <maximumf>, %46, %cst_18 [1] : vector<16x16xf32> to vector<16xf32>
    %48 = vector.shape_cast %47 : vector<16xf32> to vector<16x1xf32>
    %49 = vector.broadcast %48 : vector<16x1xf32> to vector<16x16xf32>
    %50 = arith.subf %46, %49 : vector<16x16xf32>
    %51 = math.exp %50 : vector<16x16xf32>
    %cst_19 = arith.constant dense<0.000000e+00> : vector<16xf32>
    %52 = vector.multi_reduction <add>, %51, %cst_19 [1] : vector<16x16xf32> to vector<16xf32>
    %53 = vector.shape_cast %52 : vector<16xf32> to vector<16x1xf32>
    %54 = vector.broadcast %53 : vector<16x1xf32> to vector<16x16xf32>
    %55 = arith.divf %51, %54 : vector<16x16xf32>
    %56 = arith.truncf %55 : vector<16x16xf32> to vector<16x16xbf16>
    %cst_20 = arith.constant dense<0.000000e+00> : vector<16x8xf32>
    %57 = tpu.matmul %56, %44, %cst_20 {dimension_numbers = #tpu.dot_dimension_numbers<[1], [0], [0], [1], [0, 0, 1, 1], [], []>} : vector<16x16xbf16>, vector<16x8xbf16>, vector<16x8xf32> -> vector<16x8xf32>
    %c0_21 = arith.constant 0 : index
    %c8 = arith.constant 8 : index
    %58 = vector.load %arg13[%c0_21, %c8] : memref<16x32xf32, #tpu.memory_space<vmem>>, vector<16x8xf32>
    tpu.vector_store %arg13[%c0_21, %c8], %57 {strides = array<i32>} : memref<16x32xf32, #tpu.memory_space<vmem>>, vector<16x8xf32>,
    %59 = vector.extract_strided_slice %15 {offsets = [0, 16], sizes = [16, 8], strides = [1, 1]} : vector<16x32xf32> to vector<16x8xf32>
    %60 = arith.truncf %59 : vector<16x8xf32> to vector<16x8xbf16>
    %61 = vector.extract_strided_slice %16 {offsets = [0, 16], sizes = [16, 8], strides = [1, 1]} : vector<16x32xf32> to vector<16x8xf32>
    %62 = arith.truncf %61 : vector<16x8xf32> to vector<16x8xbf16>
    %63 = vector.extract_strided_slice %17 {offsets = [0, 16], sizes = [16, 8], strides = [1, 1]} : vector<16x32xf32> to vector<16x8xf32>
    %64 = arith.truncf %63 : vector<16x8xf32> to vector<16x8xbf16>
    %cst_22 = arith.constant dense<0.000000e+00> : vector<16x16xf32>
    %65 = tpu.matmul %60, %62, %cst_22 {dimension_numbers = #tpu.dot_dimension_numbers<[1], [1], [0], [0], [0, 0, 1, 0], [], []>} : vector<16x8xbf16>, vector<16x8xbf16>, vector<16x16xf32> -> vector<16x16xf32>
    %66 = arith.addf %65, %18 : vector<16x16xf32>
    %cst_23 = arith.constant dense<0xFF800000> : vector<16xf32>
    %67 = vector.multi_reduction <maximumf>, %66, %cst_23 [1] : vector<16x16xf32> to vector<16xf32>
    %68 = vector.shape_cast %67 : vector<16xf32> to vector<16x1xf32>
    %69 = vector.broadcast %68 : vector<16x1xf32> to vector<16x16xf32>
    %70 = arith.subf %66, %69 : vector<16x16xf32>
    %71 = math.exp %70 : vector<16x16xf32>
    %cst_24 = arith.constant dense<0.000000e+00> : vector<16xf32>
    %72 = vector.multi_reduction <add>, %71, %cst_24 [1] : vector<16x16xf32> to vector<16xf32>
    %73 = vector.shape_cast %72 : vector<16xf32> to vector<16x1xf32>
    %74 = vector.broadcast %73 : vector<16x1xf32> to vector<16x16xf32>
    %75 = arith.divf %71, %74 : vector<16x16xf32>
    %76 = arith.truncf %75 : vector<16x16xf32> to vector<16x16xbf16>
    %cst_25 = arith.constant dense<0.000000e+00> : vector<16x8xf32>
    %77 = tpu.matmul %76, %64, %cst_25 {dimension_numbers = #tpu.dot_dimension_numbers<[1], [0], [0], [1], [0, 0, 1, 1], [], []>} : vector<16x16xbf16>, vector<16x8xbf16>, vector<16x8xf32> -> vector<16x8xf32>
    %c0_26 = arith.constant 0 : index
    %c16 = arith.constant 16 : index
    %78 = vector.load %arg13[%c0_26, %c16] : memref<16x32xf32, #tpu.memory_space<vmem>>, vector<16x8xf32>
    tpu.vector_store %arg13[%c0_26, %c16], %77 {strides = array<i32>} : memref<16x32xf32, #tpu.memory_space<vmem>>, vector<16x8xf32>,
    %79 = vector.extract_strided_slice %15 {offsets = [0, 24], sizes = [16, 8], strides = [1, 1]} : vector<16x32xf32> to vector<16x8xf32>
    %80 = arith.truncf %79 : vector<16x8xf32> to vector<16x8xbf16>
    %81 = vector.extract_strided_slice %16 {offsets = [0, 24], sizes = [16, 8], strides = [1, 1]} : vector<16x32xf32> to vector<16x8xf32>
    %82 = arith.truncf %81 : vector<16x8xf32> to vector<16x8xbf16>
    %83 = vector.extract_strided_slice %17 {offsets = [0, 24], sizes = [16, 8], strides = [1, 1]} : vector<16x32xf32> to vector<16x8xf32>
    %84 = arith.truncf %83 : vector<16x8xf32> to vector<16x8xbf16>
    %cst_27 = arith.constant dense<0.000000e+00> : vector<16x16xf32>
    %85 = tpu.matmul %80, %82, %cst_27 {dimension_numbers = #tpu.dot_dimension_numbers<[1], [1], [0], [0], [0, 0, 1, 0], [], []>} : vector<16x8xbf16>, vector<16x8xbf16>, vector<16x16xf32> -> vector<16x16xf32>
    %86 = arith.addf %85, %18 : vector<16x16xf32>
    %cst_28 = arith.constant dense<0xFF800000> : vector<16xf32>
    %87 = vector.multi_reduction <maximumf>, %86, %cst_28 [1] : vector<16x16xf32> to vector<16xf32>
    %88 = vector.shape_cast %87 : vector<16xf32> to vector<16x1xf32>
    %89 = vector.broadcast %88 : vector<16x1xf32> to vector<16x16xf32>
    %90 = arith.subf %86, %89 : vector<16x16xf32>
    %91 = math.exp %90 : vector<16x16xf32>
    %cst_29 = arith.constant dense<0.000000e+00> : vector<16xf32>
    %92 = vector.multi_reduction <add>, %91, %cst_29 [1] : vector<16x16xf32> to vector<16xf32>
    %93 = vector.shape_cast %92 : vector<16xf32> to vector<16x1xf32>
    %94 = vector.broadcast %93 : vector<16x1xf32> to vector<16x16xf32>
    %95 = arith.divf %91, %94 : vector<16x16xf32>
    %96 = arith.truncf %95 : vector<16x16xf32> to vector<16x16xbf16>
    %cst_30 = arith.constant dense<0.000000e+00> : vector<16x8xf32>
    %97 = tpu.matmul %96, %84, %cst_30 {dimension_numbers = #tpu.dot_dimension_numbers<[1], [0], [0], [1], [0, 0, 1, 1], [], []>} : vector<16x16xbf16>, vector<16x8xbf16>, vector<16x8xf32> -> vector<16x8xf32>
    %c0_31 = arith.constant 0 : index
    %c24 = arith.constant 24 : index
    %98 = vector.load %arg13[%c0_31, %c24] : memref<16x32xf32, #tpu.memory_space<vmem>>, vector<16x8xf32>
    tpu.vector_store %arg13[%c0_31, %c24], %97 {strides = array<i32>} : memref<16x32xf32, #tpu.memory_space<vmem>>, vector<16x8xf32>,
    %c0_32 = arith.constant 0 : index
    %c0_33 = arith.constant 0 : index
    %99 = vector.load %arg13[%c0_32, %c0_33] : memref<16x32xf32, #tpu.memory_space<vmem>>, vector<16x32xf32>
    %100 = arith.truncf %99 : vector<16x32xf32> to vector<16x32xbf16>
    %c0_34 = arith.constant 0 : index
    %c0_35 = arith.constant 0 : index
    %c0_36 = arith.constant 0 : index
    %101 = vector.load %arg5[%c0_34, %c0_35, %c0_36] : memref<1x32x32xbf16, #tpu.memory_space<vmem>>, vector<1x32x32xbf16>
    %102 = vector.shape_cast %101 : vector<1x32x32xbf16> to vector<32x32xbf16>
    %cst_37 = arith.constant dense<0.000000e+00> : vector<16x32xf32>
    %103 = tpu.matmul %100, %102, %cst_37 {dimension_numbers = #tpu.dot_dimension_numbers<[1], [0], [0], [1], [0, 0, 1, 1], [], []>} : vector<16x32xbf16>, vector<32x32xbf16>, vector<16x32xf32> -> vector<16x32xf32>
    %104 = vector.extract_strided_slice %5 {offsets = [1, 0], sizes = [1, 32], strides = [1, 1]} : vector<8x128xf32> to vector<1x32xf32>
    %105 = vector.broadcast %104 : vector<1x32xf32> to vector<16x32xf32>
    %106 = arith.addf %103, %105 : vector<16x32xf32>
    %107 = arith.addf %3, %106 : vector<16x32xf32>
    %108 = vector.extract_strided_slice %5 {offsets = [2, 0], sizes = [1, 32], strides = [1, 1]} : vector<8x128xf32> to vector<1x32xf32>
    %109 = vector.extract_strided_slice %5 {offsets = [3, 0], sizes = [1, 32], strides = [1, 1]} : vector<8x128xf32> to vector<1x32xf32>
    %cst_38 = arith.constant dense<0.000000e+00> : vector<16xf32>
    %110 = vector.multi_reduction <add>, %107, %cst_38 [1] : vector<16x32xf32> to vector<16xf32>
    %111 = vector.shape_cast %110 : vector<16xf32> to vector<16x1xf32>
    %cst_39 = arith.constant 3.200000e+01 : f32
    %112 = vector.broadcast %cst_39 : f32 to vector<16x1xf32>
    %113 = arith.divf %111, %112 : vector<16x1xf32>
    %114 = vector.broadcast %113 : vector<16x1xf32> to vector<16x32xf32>
    %115 = arith.subf %107, %114 : vector<16x32xf32>
    %116 = arith.mulf %115, %115 : vector<16x32xf32>
    %cst_40 = arith.constant dense<0.000000e+00> : vector<16xf32>
    %117 = vector.multi_reduction <add>, %116, %cst_40 [1] : vector<16x32xf32> to vector<16xf32>
    %118 = vector.shape_cast %117 : vector<16xf32> to vector<16x1xf32>
    %cst_41 = arith.constant 3.200000e+01 : f32
    %119 = vector.broadcast %cst_41 : f32 to vector<16x1xf32>
    %120 = arith.divf %118, %119 : vector<16x1xf32>
    %121 = vector.broadcast %113 : vector<16x1xf32> to vector<16x32xf32>
    %122 = arith.subf %107, %121 : vector<16x32xf32>
    %cst_42 = arith.constant 9.99999996E-13 : f32
    %123 = vector.broadcast %cst_42 : f32 to vector<16x1xf32>
    %124 = arith.addf %120, %123 : vector<16x1xf32>
    %125 = math.rsqrt %124 : vector<16x1xf32>
    %126 = vector.broadcast %125 : vector<16x1xf32> to vector<16x32xf32>
    %127 = arith.mulf %122, %126 : vector<16x32xf32>
    %128 = vector.broadcast %108 : vector<1x32xf32> to vector<16x32xf32>
    %129 = arith.mulf %127, %128 : vector<16x32xf32>
    %130 = vector.broadcast %109 : vector<1x32xf32> to vector<16x32xf32>
    %131 = arith.addf %129, %130 : vector<16x32xf32>
    %132 = arith.truncf %131 : vector<16x32xf32> to vector<16x32xbf16>
    %c0_43 = arith.constant 0 : index
    %c0_44 = arith.constant 0 : index
    %c0_45 = arith.constant 0 : index
    %133 = vector.load %arg6[%c0_43, %c0_44, %c0_45] : memref<1x32x64xbf16, #tpu.memory_space<vmem>>, vector<1x32x64xbf16>
    %134 = vector.shape_cast %133 : vector<1x32x64xbf16> to vector<32x64xbf16>
    %cst_46 = arith.constant dense<0.000000e+00> : vector<16x64xf32>
    %135 = tpu.matmul %132, %134, %cst_46 {dimension_numbers = #tpu.dot_dimension_numbers<[1], [0], [0], [1], [0, 0, 1, 1], [], []>} : vector<16x32xbf16>, vector<32x64xbf16>, vector<16x64xf32> -> vector<16x64xf32>
    %136 = vector.extract_strided_slice %5 {offsets = [4, 0], sizes = [1, 64], strides = [1, 1]} : vector<8x128xf32> to vector<1x64xf32>
    %137 = vector.broadcast %136 : vector<1x64xf32> to vector<16x64xf32>
    %138 = arith.addf %135, %137 : vector<16x64xf32>
    %cst_47 = arith.constant 5.000000e-01 : f32
    %139 = vector.broadcast %cst_47 : f32 to vector<16x64xf32>
    %140 = arith.mulf %139, %138 : vector<16x64xf32>
    %cst_48 = arith.constant 0.707106769 : f32
    %141 = vector.broadcast %cst_48 : f32 to vector<16x64xf32>
    %142 = arith.mulf %138, %141 : vector<16x64xf32>
    %143 = math.erf %142 : vector<16x64xf32>
    %cst_49 = arith.constant 1.000000e+00 : f32
    %144 = vector.broadcast %cst_49 : f32 to vector<16x64xf32>
    %145 = arith.addf %144, %143 : vector<16x64xf32>
    %146 = arith.mulf %140, %145 : vector<16x64xf32>
    %147 = arith.truncf %146 : vector<16x64xf32> to vector<16x64xbf16>
    %c0_50 = arith.constant 0 : index
    %c0_51 = arith.constant 0 : index
    %c0_52 = arith.constant 0 : index
    %148 = vector.load %arg7[%c0_50, %c0_51, %c0_52] : memref<1x64x32xbf16, #tpu.memory_space<vmem>>, vector<1x64x32xbf16>
    %149 = vector.shape_cast %148 : vector<1x64x32xbf16> to vector<64x32xbf16>
    %cst_53 = arith.constant dense<0.000000e+00> : vector<16x32xf32>
    %150 = tpu.matmul %147, %149, %cst_53 {dimension_numbers = #tpu.dot_dimension_numbers<[1], [0], [0], [1], [0, 0, 1, 1], [], []>} : vector<16x64xbf16>, vector<64x32xbf16>, vector<16x32xf32> -> vector<16x32xf32>
    %151 = vector.extract_strided_slice %5 {offsets = [5, 0], sizes = [1, 32], strides = [1, 1]} : vector<8x128xf32> to vector<1x32xf32>
    %152 = vector.broadcast %151 : vector<1x32xf32> to vector<16x32xf32>
    %153 = arith.addf %150, %152 : vector<16x32xf32>
    %154 = arith.addf %131, %153 : vector<16x32xf32>
    %155 = vector.extract_strided_slice %5 {offsets = [6, 0], sizes = [1, 32], strides = [1, 1]} : vector<8x128xf32> to vector<1x32xf32>
    %156 = vector.extract_strided_slice %5 {offsets = [7, 0], sizes = [1, 32], strides = [1, 1]} : vector<8x128xf32> to vector<1x32xf32>
    %cst_54 = arith.constant dense<0.000000e+00> : vector<16xf32>
    %157 = vector.multi_reduction <add>, %154, %cst_54 [1] : vector<16x32xf32> to vector<16xf32>
    %158 = vector.shape_cast %157 : vector<16xf32> to vector<16x1xf32>
    %cst_55 = arith.constant 3.200000e+01 : f32
    %159 = vector.broadcast %cst_55 : f32 to vector<16x1xf32>
    %160 = arith.divf %158, %159 : vector<16x1xf32>
    %161 = vector.broadcast %160 : vector<16x1xf32> to vector<16x32xf32>
    %162 = arith.subf %154, %161 : vector<16x32xf32>
    %163 = arith.mulf %162, %162 : vector<16x32xf32>
    %cst_56 = arith.constant dense<0.000000e+00> : vector<16xf32>
    %164 = vector.multi_reduction <add>, %163, %cst_56 [1] : vector<16x32xf32> to vector<16xf32>
    %165 = vector.shape_cast %164 : vector<16xf32> to vector<16x1xf32>
    %cst_57 = arith.constant 3.200000e+01 : f32
    %166 = vector.broadcast %cst_57 : f32 to vector<16x1xf32>
    %167 = arith.divf %165, %166 : vector<16x1xf32>
    %168 = vector.broadcast %160 : vector<16x1xf32> to vector<16x32xf32>
    %169 = arith.subf %154, %168 : vector<16x32xf32>
    %cst_58 = arith.constant 9.99999996E-13 : f32
    %170 = vector.broadcast %cst_58 : f32 to vector<16x1xf32>
    %171 = arith.addf %167, %170 : vector<16x1xf32>
    %172 = math.rsqrt %171 : vector<16x1xf32>
    %173 = vector.broadcast %172 : vector<16x1xf32> to vector<16x32xf32>
    %174 = arith.mulf %169, %173 : vector<16x32xf32>
    %175 = vector.broadcast %155 : vector<1x32xf32> to vector<16x32xf32>
    %176 = arith.mulf %174, %175 : vector<16x32xf32>
    %177 = vector.broadcast %156 : vector<1x32xf32> to vector<16x32xf32>
    %178 = arith.addf %176, %177 : vector<16x32xf32>
    %c0_59 = arith.constant 0 : index
    %c0_60 = arith.constant 0 : index
    %179 = vector.load %arg12[%c0_59, %c0_60] : memref<16x32xf32, #tpu.memory_space<vmem>>, vector<16x32xf32>
    tpu.vector_store %arg12[%c0_59, %c0_60], %178 {strides = array<i32>} : memref<16x32xf32, #tpu.memory_space<vmem>>, vector<16x32xf32>,
    %c1_i32 = arith.constant 1 : i32
    %180 = arith.cmpi eq, %arg0, %c1_i32 : i32
    %181 = arith.extui %180 : i1 to i32
    %c0_i32_61 = arith.constant 0 : i32
    %182 = arith.cmpi ne, %181, %c0_i32_61 : i32
    scf.if %182 {
      %183 = arith.truncf %178 : vector<16x32xf32> to vector<16x32xbf16>
      %c0_62 = arith.constant 0 : index
      %c0_63 = arith.constant 0 : index
      %184 = vector.load %arg9[%c0_62, %c0_63] : memref<32x32xbf16, #tpu.memory_space<vmem>>, vector<32x32xbf16>
      %cst_64 = arith.constant dense<0.000000e+00> : vector<16x32xf32>
      %185 = tpu.matmul %183, %184, %cst_64 {dimension_numbers = #tpu.dot_dimension_numbers<[1], [0], [0], [1], [0, 0, 1, 1], [], []>} : vector<16x32xbf16>, vector<32x32xbf16>, vector<16x32xf32> -> vector<16x32xf32>
      %c2 = arith.constant 2 : index
      %c0_65 = arith.constant 0 : index
      %186 = vector.load %arg3[%c2, %c0_65] : memref<4x128xf32, #tpu.memory_space<vmem>>, vector<1x32xf32>
      %187 = vector.broadcast %186 : vector<1x32xf32> to vector<16x32xf32>
      %188 = arith.addf %185, %187 : vector<16x32xf32>
      %cst_66 = arith.constant 0.000000e+00 : f32
      %189 = vector.broadcast %cst_66 : f32 to vector<16x32xf32>
      %190 = arith.maximumf %188, %189 : vector<16x32xf32>
      %191 = arith.truncf %190 : vector<16x32xf32> to vector<16x32xbf16>
      %c0_67 = arith.constant 0 : index
      %c0_68 = arith.constant 0 : index
      %192 = vector.load %arg10[%c0_67, %c0_68] : memref<32x128xbf16, #tpu.memory_space<vmem>>, vector<32x128xbf16>
      %cst_69 = arith.constant dense<0.000000e+00> : vector<16x128xf32>
      %193 = tpu.matmul %191, %192, %cst_69 {dimension_numbers = #tpu.dot_dimension_numbers<[1], [0], [0], [1], [0, 0, 1, 1], [], []>} : vector<16x32xbf16>, vector<32x128xbf16>, vector<16x128xf32> -> vector<16x128xf32>
      %c3 = arith.constant 3 : index
      %c0_70 = arith.constant 0 : index
      %194 = vector.load %arg3[%c3, %c0_70] : memref<4x128xf32, #tpu.memory_space<vmem>>, vector<1x128xf32>
      %195 = vector.broadcast %194 : vector<1x128xf32> to vector<16x128xf32>
      %196 = arith.addf %193, %195 : vector<16x128xf32>
      %c0_71 = arith.constant 0 : index
      %c0_72 = arith.constant 0 : index
      %197 = vector.load %arg11[%c0_71, %c0_72] : memref<16x128xf32, #tpu.memory_space<vmem>>, vector<16x128xf32>
      tpu.vector_store %arg11[%c0_71, %c0_72], %196 {strides = array<i32>} : memref<16x128xf32, #tpu.memory_space<vmem>>, vector<16x128xf32>,
    } else {
    }
    return
  }
  func.func @transform_0(%arg0: i32) -> (i32, i32) {
    %c0_i32 = arith.constant 0 : i32
    %c0_i32_0 = arith.constant 0 : i32
    %c0_i32_1 = arith.constant 0 : i32
    return %c0_i32, %c0_i32_0 : i32, i32
  }
  func.func @transform_1(%arg0: i32) -> (i32, i32) {
    %c0_i32 = arith.constant 0 : i32
    %c0_i32_0 = arith.constant 0 : i32
    %c0_i32_1 = arith.constant 0 : i32
    return %c0_i32, %c0_i32_0 : i32, i32
  }
  func.func @transform_2(%arg0: i32) -> (i32, i32) {
    %c0_i32 = arith.constant 0 : i32
    %c0_i32_0 = arith.constant 0 : i32
    %c0_i32_1 = arith.constant 0 : i32
    return %c0_i32, %c0_i32_0 : i32, i32
  }
  func.func @transform_3(%arg0: i32) -> (i32, i32, i32) {
    %c0_i32 = arith.constant 0 : i32
    %c0_i32_0 = arith.constant 0 : i32
    %c0_i32_1 = arith.constant 0 : i32
    return %arg0, %c0_i32, %c0_i32_0 : i32, i32, i32
  }
  func.func @transform_4(%arg0: i32) -> (i32, i32, i32) {
    %c0_i32 = arith.constant 0 : i32
    %c0_i32_0 = arith.constant 0 : i32
    %c0_i32_1 = arith.constant 0 : i32
    return %arg0, %c0_i32, %c0_i32_0 : i32, i32, i32
  }
  func.func @transform_5(%arg0: i32) -> (i32, i32, i32) {
    %c0_i32 = arith.constant 0 : i32
    %c0_i32_0 = arith.constant 0 : i32
    %c0_i32_1 = arith.constant 0 : i32
    return %arg0, %c0_i32, %c0_i32_0 : i32, i32, i32
  }
  func.func @transform_6(%arg0: i32) -> (i32, i32, i32) {
    %c0_i32 = arith.constant 0 : i32
    %c0_i32_0 = arith.constant 0 : i32
    %c0_i32_1 = arith.constant 0 : i32
    return %arg0, %c0_i32, %c0_i32_0 : i32, i32, i32
  }
  func.func @transform_7(%arg0: i32) -> (i32, i32, i32) {
    %c0_i32 = arith.constant 0 : i32
    %c0_i32_0 = arith.constant 0 : i32
    %c0_i32_1 = arith.constant 0 : i32
    return %arg0, %c0_i32, %c0_i32_0 : i32, i32, i32
  }
  func.func @transform_8(%arg0: i32) -> (i32, i32) {
    %c0_i32 = arith.constant 0 : i32
    %c0_i32_0 = arith.constant 0 : i32
    %c0_i32_1 = arith.constant 0 : i32
    return %c0_i32, %c0_i32_0 : i32, i32
  }
  func.func @transform_9(%arg0: i32) -> (i32, i32) {
    %c0_i32 = arith.constant 0 : i32
    %c0_i32_0 = arith.constant 0 : i32
    %c0_i32_1 = arith.constant 0 : i32
    return %c0_i32, %c0_i32_0 : i32, i32
  }
  func.func @transform_10(%arg0: i32) -> (i32, i32) {
    %c0_i32 = arith.constant 0 : i32
    %c0_i32_0 = arith.constant 0 : i32
    %c0_i32_1 = arith.constant 0 : i32
    return %c0_i32, %c0_i32_0 : i32, i32
  }
}

</mosaic_0001>

<bundles_post_ra>
// kernel: forward.1
= control target key start
LH: loop header
LB: loop body
LE: loop exit
PB: predicated region body
PF: predicated region fallthrough
CT: control target
= control target key end

     0   :  { %s1950_s13 = smov 0   ;;  %s2184_s0 = inlined_call_operand.vmem [shape: f32[16,32], index: 0, kind: input, shape index: {}]   ;;  %s2185_s1 = inlined_call_operand.vmem [shape: f32[16,16], index: 1, kind: input, shape index: {}]   ;;  %s2186_s2 = inlined_call_operand.vmem [shape: f32[4,128], index: 2, kind: input, shape index: {}]   ;;  %s2187_s3 = inlined_call_operand.vmem [shape: bf16[2,32,96], index: 3, kind: input, shape index: {}]   ;;  %s2188_s4 = inlined_call_operand.vmem [shape: bf16[2,32,32], index: 4, kind: input, shape index: {}]   ;;  %s2189_s5 = inlined_call_operand.vmem [shape: bf16[2,32,64], index: 5, kind: input, shape index: {}]   ;;  %s2190_s6 = inlined_call_operand.vmem [shape: bf16[2,64,32], index: 6, kind: input, shape index: {}]   ;;  %s2191_s7 = inlined_call_operand.vmem [shape: f32[2,8,128], index: 7, kind: input, shape index: {}]   ;;  %s2192_s8 = inlined_call_operand.vmem [shape: bf16[32,32], index: 8, kind: input, shape index: {}]   ;;  %s2193_s9 = inlined_call_operand.vmem [shape: bf16[32,128], index: 9, kind: input, shape index: {}]   ;;  %s2194_s10 = inlined_call_operand.vmem [shape: f32[16,128], index: 10, kind: output, shape index: {}]  }
   0x1 LB: > { %s1956_s14 = sadd.s32 4294967295, %s1875_s13   ;;  %p1595_p0 = scmp.ge.s32.totalorder %s1875_s13, 1  ;;  %s1875_s13 = sphi %s1950_s13, %s20_s13  }
   0x2   : > { %p346_p1 = scmp.lt.s32.totalorder %s1875_s13, 3 }
   0x4   : > { %p347_p2 = pnand %p1595_p0, %p346_p1 }
   0x5   : > { %p398_p3 = scmp.lt.s32.totalorder (!%p347_p2), %s1956_s14, 1  ;;  %p1605_p4 = scmp.ne.s32.totalorder (!%p347_p2), %s1956_s14, 0 }
   0x6   : > { %350 = sbr.rel (%p347_p2) target bundleno = 3226 (0xc9a), region = 60 }
   0xb   : > { %s399_s15 = scalar_select %p398_p3, %s1956_s14, 1 }
   0xd   : > { %s1641_s16 = sshll.u32 %s399_s15, 4  ;;  %s1644_s17 = sshll.u32 %s399_s15, 5 }
   0xe   : > { %s1965_s20 = scalar_lea.vmem %s2187_s3, %s1641_s16  ;;  %s1970_s23 = scalar_lea.vmem %s2188_s4, %s1641_s16 }
   0xf   : > { %s1975_s26 = scalar_lea.vmem %s2189_s5, %s1641_s16  ;;  %s1980_s29 = scalar_lea.vmem %s2190_s6, %s1644_s17 }
  0x10   : > { %s1604_s30 = sshll.u32 %s399_s15, 3  ;;  %426 = sbr.rel (%p1605_p4) target bundleno = 335 (0x14f), region = 64 }
  0x11   : > { %s1985_s18 = scalar_lea.vmem %s2191_s7, %s1604_s30 }
  0x15   : > { %v427_v0 = vld [vmem:[%s2184_s0] sm:$0xff]  ;;  %vm431_vm0 = vcmask 261120   ;;  %v428_v1 = vld [vmem:[%s2184_s0 + $0x8] sm:$0xff] }
  0x16   : > { %v432_v2 = vsel %vm431_vm0, %v427_v0, 0.0  ;;  %v435_v3 = vsel %vm431_vm0, %v428_v1, 0.0  ;;  %v1606_v21 = vld [vmem:[%s2186_s2] ss:$0 sm:$0xff]  ;;  %v1607_v23 = vld [vmem:[%s2186_s2 + $0x1] ss:$0 sm:$0xff] }
  0x17   : > { %433 = vadd.xlane.f32.xlu0 %v432_v2 }
  0x1b   : > { %436 = vadd.xlane.f32.xlu0 %v435_v3 }
  0xa0   : > { %v434_v4 = vpop.xlane.xlu0 %433 }
  0xa1   : > { %v439_v5 = vmul.f32 0.03125, %v434_v4 }
  0xa3   : > { %v441_v6 = vsub.f32 %v427_v0, %v439_v5 }
  0xa4   : > { %v437_v7 = vpop.xlane.xlu0 %436 }
  0xa5   : > { %v440_v8 = vmul.f32 0.03125, %v437_v7  ;;  %v443_v9 = vmul.f32 %v441_v6, %v441_v6 }
  0xa7   : > { %v442_v10 = vsub.f32 %v428_v1, %v440_v8  ;;  %v445_v11 = vsel %vm431_vm0, %v443_v9, 0.0 }
  0xa8   : > { %446 = vadd.xlane.f32.xlu1 %v445_v11 }
  0xa9   : > { %v444_v12 = vmul.f32 %v442_v10, %v442_v10 }
  0xab   : > { %v448_v13 = vsel %vm431_vm0, %v444_v12, 0.0 }
  0xac   : > { %449 = vadd.xlane.f32.xlu1 %v448_v13 }
 0x131   : > { %v447_v14 = vpop.xlane.xlu1 %446 }
 0x132   : > { %v451_v15 = vmul.f32 0.03125, %v447_v14 }
 0x134   : > { %v453_v16 = vadd.f32 1e-12, %v451_v15 }
 0x135   : > { %v450_v17 = vpop.xlane.xlu1 %449 }
 0x136   : > { %1807 = vrsqrt.f32 %v453_v16  ;;  %v452_v18 = vmul.f32 0.03125, %v450_v17 }
 0x138   : > { %v454_v19 = vadd.f32 1e-12, %v452_v18 }
 0x13a   : > { %1809 = vrsqrt.f32 %v454_v19 }
 0x143   : > { %v1808_v20 = vpop.eup %1807 }
 0x144   : > { %v457_v22 = vmul.f32 %v1808_v20, %v441_v6 }
 0x146   : > { %v463_v24 = vmul.f32 %v1606_v21, %v457_v22 }
 0x147   : > { %v1810_v25 = vpop.eup %1809 }
 0x148   : > { %v469_v26 = vadd.f32 %v1607_v23, %v463_v24  ;;  %v458_v27 = vmul.f32 %v1810_v25, %v442_v10 }
 0x14a   : > { %471 = vst.msk [vmem:[#allocation2] sm:$0xff] %vm431_vm0, %v469_v26  ;;  %v464_v28 = vmul.f32 %v1606_v21, %v458_v27 }
 0x14c   : > { %v470_v29 = vadd.f32 %v1607_v23, %v464_v28 }
 0x14e   : > { %472 = vst.msk [vmem:[#allocation2 + $0x8] sm:$0xff] %vm431_vm0, %v470_v29 }
 0x14f PF: > { %v1811_v30 = vld [vmem:[%s1965_s20 + $0x8] sm:$0xff]   ;;  %v1877_v31 = vmov 0.0   ;;  %v1812_v32 = vld [vmem:[%s1965_s20] sm:$0xff]   ;;  %vm1878_vm1 = vmmov 0   ;;  %vm497_vm2 = vcmask 261120   ;;  %v481_v36 = vlaneseq  ;;  %s1879_s20 = smov 96  }
 0x150   : > { %1681 = vmatprep.subr.bf16.mxu0 %v1877_v31  ;;  %1689 = vmatprep.subr.bf16.mxu1 %v1877_v31  ;;  %v2029_v39 = vld [vmem:[%s1985_s18] sm:$0xff]  ;;  %s1880_s27 = smov 120   ;;  %s1881_s28 = smov 88   ;;  %vm551_vm3 = vcmask 64512   ;;  %vm599_vm4 = vcmask 130048   ;;  %v545_v2 = vld [vmem:[%s2185_s1 + $0x8] sm:$0xff] }
 0x151   : > { %1682 = vmatpush3.bf16.msra.mxu0 %v1811_v30  ;;  %1685 = vmatprep.mubr.msk.bf16.mxu0 %vm1878_vm1, %v1877_v31  ;;  %v2012_v33 = vld [vmem:[#allocation2] sm:$0xff]  ;;  %v2025_v37 = vshrl.u32 %v481_v36, 7  ;;  %s1882_s30 = smov 80   ;;  %s1883_s11 = smov 112   ;;  %vm802_vm5 = vcmask 130112   ;;  %vm934_vm6 = vcmask 195712  }
 0x152   : > { %1683 = vmatprep.subr.bf16.mxu0 %v1877_v31  ;;  %1691 = vmatprep.mubr.msk.bf16.mxu1 %vm1878_vm1, %v1877_v31  ;;  %s1884_s12 = smov 72   ;;  %s1885_s18 = smov 104   ;;  %v544_v62 = vld [vmem:[%s2185_s1] sm:$0xff]  ;;  %vm1066_vm7 = vcmask 261312   ;;  %vm1289_vm8 = vcmask 523264  }
 0x153   : > { %v483_v38 = vsub.s32 0, %v2025_v37  ;;  %s1886_s15 = smov 56   ;;  %s1887_s17 = smov 64  }
 0x154   : > { %s1888_s24 = smov 48   ;;  %s1889_s25 = smov 40  }
 0x155   : > { %v2014_v34 = vld [vmem:[#allocation2 + $0x8] sm:$0xff]  ;;  %1684 = vmatpush3.bf16.msra.mxu0 %v1812_v32  ;;  %v484_v40 = vrot.slane %v2029_v39, %v483_v38  ;;  %p1630_p5 = scmp.ne.s32.totalorder %s1956_s14, 1 }
 0x156   : > { %v476_v35 = vpack.c.bf16 %v2014_v34, %v2012_v33  ;;  %1695 = vmatprep.subr.bf16.mxu0 %v1877_v31 }
 0x158   : > { %1686 = vmatmul.mubr.msk.bf16.vlgmr.msra.gmra.mxu0 %vm497_vm2, %v476_v35 }
 0x159   : > { %1697 = vmatprep.mubr.msk.bf16.mxu0 %vm1878_vm1, %v1877_v31 }
 0x218   : > { %v535_v41 = vpop.f32.mrf.mxu0 }
 0x219   : > { %v536_v43 = vadd.f32 %v535_v41, %v484_v40 }
 0x21a   : > { %v1687_v42 = vpop.f32.mrf.mxu0 }
 0x21b   : > { %v542_v47 = vmul.f32 0.35355338, %v536_v43 }
 0x21c   : > { %v538_v44 = vpop.f32.mrf.mxu0 }
 0x21d   : > { %v539_v45 = vadd.f32 %v538_v44, %v484_v40 }
 0x21e   : > { %v1688_v46 = vpop.f32.mrf.mxu0 }
 0x21f   : > { %v543_v48 = vmul.f32 0.35355338, %v539_v45  ;;  %v2032_v49 = vpack.c.bf16 %v539_v45, %v536_v43 }
 0x221   : > { %v546_v50 = vpack.c.bf16 %v543_v48, %v542_v47  ;;  %549 = vrot.lane.b32.xlu0 %v2032_v49, %s1879_s20  ;;  %s1890_s20 = smov 8  }
 0x223   : > { %673 = vrot.lane.b32.xlu1 %v546_v50, %s1880_s27  ;;  %s1891_s27 = smov 16  }
 0x225   : > { %675 = vrot.lane.b32.xlu0 %v2032_v49, %s1881_s28  ;;  %s1892_s28 = smov 24  }
 0x227   : > { %807 = vrot.lane.b32.xlu1 %v2032_v49, %s1882_s30 }
 0x229   : > { %805 = vrot.lane.b32.xlu0 %v546_v50, %s1883_s11 }
 0x22b   : > { %939 = vrot.lane.b32.xlu1 %v2032_v49, %s1884_s12 }
 0x22d   : > { %937 = vrot.lane.b32.xlu0 %v546_v50, %s1885_s18 }
 0x293   : > { %v550_v51 = vpop.permute.xlu0 %549 }
 0x294   : > { %v556_v52 = vsel %vm551_vm3, %v550_v51, 0 }
 0x295   : > { %1690 = vmatpush3.bf16.xpose.msra.mxu1 %v556_v52  ;;  %v674_v54 = vpop.permute.xlu1 %673 }
 0x296   : > { %1701 = vmatprep.subr.bf16.mxu1 %v1877_v31 }
 0x297   : > { %v676_v53 = vpop.permute.xlu0 %675 }
 0x298   : > { %v681_v55 = vsel %vm551_vm3, %v676_v53, 0 }
 0x299   : > { %v808_v56 = vpop.permute.xlu1 %807 }
 0x29a   : > { %v813_v57 = vsel %vm551_vm3, %v808_v56, 0 }
 0x29b   : > { %v806_v59 = vpop.permute.xlu0 %805 }
 0x29c   : > { %1692 = vmatmul.mubr.msk.bf16.vlgmr.msra.gmra.mxu1 %vm551_vm3, %v546_v50 }
 0x29d   : > { %1702 = vmatpush3.bf16.xpose.msra.mxu1 %v681_v55  ;;  %1703 = vmatprep.mubr.msk.bf16.mxu1 %vm1878_vm1, %v1877_v31  ;;  %v940_v58 = vpop.permute.xlu1 %939 }
 0x29e   : > { %1713 = vmatprep.subr.bf16.mxu1 %v1877_v31  ;;  %v945_v60 = vsel %vm551_vm3, %v940_v58, 0 }
 0x29f   : > { %v938_v61 = vpop.permute.xlu0 %937 }
 0x2a4   : > { %1704 = vmatmul.mubr.msk.bf16.vlgmr.msra.gmra.mxu1 %vm551_vm3, %v674_v54 }
 0x2a5   : > { %1714 = vmatpush3.bf16.xpose.msra.mxu1 %v813_v57  ;;  %1715 = vmatprep.mubr.msk.bf16.mxu1 %vm1878_vm1, %v1877_v31 }
 0x2a6   : > { %1725 = vmatprep.subr.bf16.mxu1 %v1877_v31 }
 0x2ac   : > { %1716 = vmatmul.mubr.msk.bf16.vlgmr.msra.gmra.mxu1 %vm551_vm3, %v806_v59 }
 0x2ad   : > { %1726 = vmatpush3.bf16.xpose.msra.mxu1 %v945_v60  ;;  %1727 = vmatprep.mubr.msk.bf16.mxu1 %vm1878_vm1, %v1877_v31 }
 0x2ae   : > { %1737 = vmatprep.subr.bf16.mxu1 %v1877_v31 }
 0x2b4   : > { %1728 = vmatmul.mubr.msk.bf16.vlgmr.msra.gmra.mxu1 %vm551_vm3, %v938_v61 }
 0x2b5   : > { %1741 = vmatprep.mubr.msk.bf16.mxu1 %vm1878_vm1, %v1877_v31 }
 0x35c   : > { %v592_v63 = vpop.f32.mrf.mxu1 }
 0x35d   : > { %v593_v0 = vadd.f32 %v592_v63, %v544_v62 }
 0x35e   : > { %v1693_v1 = vpop.f32.mrf.mxu1 }
 0x35f   : > { %v600_v3 = vsel %vm599_vm4, %v593_v0, -inf }
 0x360   : > { %601 = vmax.xlane.f32.xlu1 %v600_v3  ;;  %v595_v4 = vpop.f32.mrf.mxu1 }
 0x361   : > { %v596_v5 = vadd.f32 %v595_v4, %v545_v2 }
 0x362   : > { %v1694_v6 = vpop.f32.mrf.mxu1 }
 0x363   : > { %v603_v7 = vsel %vm599_vm4, %v596_v5, -inf }
 0x364   : > { %604 = vmax.xlane.f32.xlu0 %v603_v7  ;;  %v717_v8 = vpop.f32.mrf.mxu1 }
 0x365   : > { %v718_v9 = vadd.f32 %v717_v8, %v544_v62 }
 0x366   : > { %v1705_v10 = vpop.f32.mrf.mxu1 }
 0x367   : > { %v724_v11 = vsel %vm599_vm4, %v718_v9, -inf }
 0x368   : > { %725 = vmax.xlane.f32.xlu0 %v724_v11  ;;  %v720_v12 = vpop.f32.mrf.mxu1 }
 0x369   : > { %v721_v13 = vadd.f32 %v720_v12, %v545_v2 }
 0x36a   : > { %v1706_v14 = vpop.f32.mrf.mxu1 }
 0x36b   : > { %v727_v15 = vsel %vm599_vm4, %v721_v13, -inf }
 0x36c   : > { %728 = vmax.xlane.f32.xlu1 %v727_v15  ;;  %v849_v16 = vpop.f32.mrf.mxu1 }
 0x36d   : > { %v850_v17 = vadd.f32 %v849_v16, %v544_v62 }
 0x36e   : > { %v1717_v18 = vpop.f32.mrf.mxu1 }
 0x36f   : > { %v856_v19 = vsel %vm599_vm4, %v850_v17, -inf }
 0x370   : > { %857 = vmax.xlane.f32.xlu0 %v856_v19  ;;  %v852_v20 = vpop.f32.mrf.mxu1 }
 0x371   : > { %v853_v21 = vadd.f32 %v852_v20, %v545_v2 }
 0x372   : > { %v1718_v22 = vpop.f32.mrf.mxu1 }
 0x373   : > { %v859_v23 = vsel %vm599_vm4, %v853_v21, -inf }
 0x374   : > { %860 = vmax.xlane.f32.xlu1 %v859_v23  ;;  %v981_v24 = vpop.f32.mrf.mxu1 }
 0x375   : > { %v982_v25 = vadd.f32 %v981_v24, %v544_v62 }
 0x376   : > { %v1729_v26 = vpop.f32.mrf.mxu1 }
 0x377   : > { %v988_v27 = vsel %vm599_vm4, %v982_v25, -inf }
 0x378   : > { %989 = vmax.xlane.f32.xlu0 %v988_v27  ;;  %v984_v28 = vpop.f32.mrf.mxu1 }
 0x379   : > { %v985_v29 = vadd.f32 %v984_v28, %v545_v2 }
 0x37a   : > { %v1730_v30 = vpop.f32.mrf.mxu1 }
 0x37b   : > { %v991_v32 = vsel %vm599_vm4, %v985_v29, -inf }
 0x37c   : > { %992 = vmax.xlane.f32.xlu1 %v991_v32 }
 0x3e9   : > { %v602_v35 = vpop.xlane.xlu1 %601 }
 0x3ea   : > { %v606_v36 = vsub.f32 %v593_v0, %v602_v35 }
 0x3ec   : > { %v608_v38 = vmul.f32 1.442695, %v606_v36 }
 0x3ed   : > { %v605_v40 = vpop.xlane.xlu0 %604 }
 0x3ee   : > { %1821 = vpow2.f32 %v608_v38  ;;  %v607_v41 = vsub.f32 %v596_v5, %v605_v40 }
 0x3f0   : > { %v610_v42 = vmul.f32 1.442695, %v607_v41 }
 0x3f1   : > { %v726_v43 = vpop.xlane.xlu0 %725 }
 0x3f2   : > { %1823 = vpow2.f32 %v610_v42  ;;  %v730_v44 = vsub.f32 %v718_v9, %v726_v43 }
 0x3f4   : > { %v732_v45 = vmul.f32 1.442695, %v730_v44 }
 0x3f5   : > { %v729_v53 = vpop.xlane.xlu1 %728 }
 0x3f6   : > { %1825 = vpow2.f32 %v732_v45  ;;  %v731_v54 = vsub.f32 %v721_v13, %v729_v53 }
 0x3f8   : > { %v734_v58 = vmul.f32 1.442695, %v731_v54 }
 0x3f9   : > { %v858_v55 = vpop.xlane.xlu0 %857 }
 0x3fa   : > { %v862_v57 = vsub.f32 %v850_v17, %v858_v55  ;;  %1827 = vpow2.f32 %v734_v58 }
 0x3fb   : > { %v1822_v46 = vpop.eup %1821 }
 0x3fc   : > { %v612_v47 = vsel %vm599_vm4, %v1822_v46, 0.0  ;;  %v864_v62 = vmul.f32 1.442695, %v862_v57 }
 0x3fd   : > { %613 = vadd.xlane.f32.xlu0 %v612_v47  ;;  %v861_v56 = vpop.xlane.xlu1 %860 }
 0x3fe   : > { %v863_v59 = vsub.f32 %v853_v21, %v861_v56  ;;  %1829 = vpow2.f32 %v864_v62  ;;  %v1814_v62 = vld [vmem:[%s1970_s23] sm:$0xff]  }
 0x3ff   : > { %v1824_v48 = vpop.eup %1823 }
 0x400   : > { %v615_v50 = vsel %vm599_vm4, %v1824_v48, 0.0  ;;  %v866_v0 = vmul.f32 1.442695, %v863_v59 }
 0x401   : > { %616 = vadd.xlane.f32.xlu1 %v615_v50  ;;  %v990_v60 = vpop.xlane.xlu0 %989 }
 0x402   : > { %v994_v63 = vsub.f32 %v982_v25, %v990_v60  ;;  %1831 = vpow2.f32 %v866_v0  ;;  %v1813_v60 = vld [vmem:[%s1970_s23 + $0x8] sm:$0xff]  }
 0x403   : > { %v2074_v51 = vpop.eup %1825  ;;  %1738 = vmatpush3.bf16.msra.mxu1 %v1813_v60  ;;  %v1817_v60 = vld [vmem:[%s1980_s29 + $0x18] sm:$0xff]  }
 0x404   : > { %v736_v52 = vsel %vm599_vm4, %v2074_v51, 0.0  ;;  %v996_v2 = vmul.f32 1.442695, %v994_v63  ;;  %1739 = vmatprep.subr.bf16.mxu1 %v1877_v31 }
 0x405   : > { %737 = vadd.xlane.f32.xlu0 %v736_v52  ;;  %v993_v61 = vpop.xlane.xlu1 %992 }
 0x406   : > { %v995_v1 = vsub.f32 %v985_v29, %v993_v61  ;;  %1833 = vpow2.f32 %v996_v2 }
 0x407   : > { %v1828_v4 = vpop.eup %1827  ;;  %1740 = vmatpush3.bf16.msra.mxu1 %v1814_v62  ;;  %v1819_v62 = vld [vmem:[%s1980_s29 + $0x8] sm:$0xff]  }
 0x408   : > { %v998_v3 = vmul.f32 1.442695, %v995_v1  ;;  %v739_v6 = vsel %vm599_vm4, %v1828_v4, 0.0  ;;  %1753 = vmatprep.subr.bf16.mxu1 %v1877_v31 }
 0x40a   : > { %1835 = vpow2.f32 %v998_v3 }
 0x40b   : > { %v1830_v5 = vpop.eup %1829 }
 0x40c   : > { %v868_v9 = vsel %vm599_vm4, %v1830_v5, 0.0 }
 0x40f   : > { %v1832_v7 = vpop.eup %1831 }
 0x410   : > { %v871_v10 = vsel %vm599_vm4, %v1832_v7, 0.0 }
 0x412   : > { %747 = vrot.lane.b32.xlu1 %v2032_v49, %s1886_s15 }
 0x413   : > { %v2081_v8 = vpop.eup %1833 }
 0x414   : > { %v1000_v12 = vsel %vm599_vm4, %v2081_v8, 0.0 }
 0x417   : > { %v1836_v11 = vpop.eup %1835 }
 0x418   : > { %v1003_v13 = vsel %vm599_vm4, %v1836_v11, 0.0 }
 0x41b   : > { %623 = vrot.lane.b32.xlu0 %v2032_v49, %s1887_s17 }
 0x436   : > { %740 = vadd.xlane.f32.xlu1 %v739_v6 }
 0x43a   : > { %869 = vadd.xlane.f32.xlu0 %v868_v9  ;;  %872 = vadd.xlane.f32.xlu1 %v871_v10 }
 0x43e   : > { %1001 = vadd.xlane.f32.xlu0 %v1000_v12  ;;  %1004 = vadd.xlane.f32.xlu1 %v1003_v13 }
 0x44f   : > { %879 = vrot.lane.b32.xlu1 %v2032_v49, %s1888_s24 }
 0x454   : > { %1011 = vrot.lane.b32.xlu0 %v2032_v49, %s1889_s25 }
 0x486   : > { %v614_v14 = vpop.xlane.xlu0 %613 }
 0x487   : > { %1837 = vrcp.f32 %v614_v14  ;;  %v1078_v14 = vsub.s32 1, %v2025_v37 }
 0x48a   : > { %v617_v15 = vpop.xlane.xlu1 %616 }
 0x48b   : > { %1839 = vrcp.f32 %v617_v15  ;;  %v1079_v15 = vrot.slane %v2029_v39, %v1078_v14 }
 0x48e   : > { %v738_v16 = vpop.xlane.xlu0 %737  ;;  %v748_v23 = vpop.permute.xlu1 %747 }
 0x48f   : > { %1841 = vrcp.f32 %v738_v16 }
 0x492   : > { %v624_v17 = vpop.permute.xlu0 %623 }
 0x493   : > { %1696 = vmatpush3.bf16.msra.mxu0 %v624_v17 }
 0x494   : > { %1707 = vmatprep.subr.bf16.mxu0 %v1877_v31  ;;  %v1838_v18 = vpop.eup %1837 }
 0x495   : > { %v619_v20 = vmul.f32 %v1838_v18, %v1822_v46 }
 0x498   : > { %v1840_v19 = vpop.eup %1839 }
 0x499   : > { %v621_v21 = vmul.f32 %v1840_v19, %v1824_v48 }
 0x49b   : > { %v622_v22 = vpack.c.bf16 %v621_v21, %v619_v20 }
 0x49c   : > { %v1842_v28 = vpop.eup %1841 }
 0x49d   : > { %1698 = vmatmul.mubr.msk.bf16.vlgmr.msra.gmra.mxu0 %vm599_vm4, %v622_v22  ;;  %v743_v30 = vmul.f32 %v1842_v28, %v2074_v51 }
 0x49e   : > { %1708 = vmatpush3.bf16.msra.mxu0 %v748_v23  ;;  %1709 = vmatprep.mubr.msk.bf16.mxu0 %vm1878_vm1, %v1877_v31 }
 0x49f   : > { %1719 = vmatprep.subr.bf16.mxu0 %v1877_v31 }
 0x4bf   : > { %v741_v49 = vpop.xlane.xlu1 %740 }
 0x4c0   : > { %1843 = vrcp.f32 %v741_v49 }
 0x4c3   : > { %v870_v24 = vpop.xlane.xlu0 %869  ;;  %v873_v25 = vpop.xlane.xlu1 %872 }
 0x4c4   : > { %1845 = vrcp.f32 %v870_v24 }
 0x4c5   : > { %1847 = vrcp.f32 %v873_v25 }
 0x4c7   : > { %v1002_v26 = vpop.xlane.xlu0 %1001  ;;  %v1005_v27 = vpop.xlane.xlu1 %1004 }
 0x4c8   : > { %1849 = vrcp.f32 %v1002_v26 }
 0x4c9   : > { %1851 = vrcp.f32 %v1005_v27 }
 0x4cb   : > { %v880_v40 = vpop.permute.xlu1 %879  ;;  %v1012_v46 = vpop.permute.xlu0 %1011 }
 0x4cd   : > { %v1844_v29 = vpop.eup %1843 }
 0x4ce   : > { %v745_v32 = vmul.f32 %v1844_v29, %v1828_v4 }
 0x4d0   : > { %v746_v35 = vpack.c.bf16 %v745_v32, %v743_v30 }
 0x4d1   : > { %v1846_v36 = vpop.eup %1845 }
 0x4d2   : > { %v1848_v38 = vpop.eup %1847  ;;  %1710 = vmatmul.mubr.msk.bf16.vlgmr.msra.gmra.mxu0 %vm599_vm4, %v746_v35  ;;  %v875_v41 = vmul.f32 %v1846_v36, %v1830_v5 }
 0x4d3   : > { %1720 = vmatpush3.bf16.msra.mxu0 %v880_v40  ;;  %1721 = vmatprep.mubr.msk.bf16.mxu0 %vm1878_vm1, %v1877_v31  ;;  %v877_v42 = vmul.f32 %v1848_v38, %v1832_v7  ;;  %v1815_v38 = vld [vmem:[%s1975_s26 + $0x8] sm:$0xff]  }
 0x4d4   : > { %1731 = vmatprep.subr.bf16.mxu0 %v1877_v31 }
 0x4d5   : > { %v1850_v43 = vpop.eup %1849  ;;  %v878_v44 = vpack.c.bf16 %v877_v42, %v875_v41 }
 0x4d6   : > { %v1852_v45 = vpop.eup %1851  ;;  %v1007_v47 = vmul.f32 %v1850_v43, %v2081_v8 }
 0x4d7   : > { %v1009_v48 = vmul.f32 %v1852_v45, %v1836_v11 }
 0x4d9   : > { %v1010_v50 = vpack.c.bf16 %v1009_v48, %v1007_v47 }
 0x4da   : > { %1722 = vmatmul.mubr.msk.bf16.vlgmr.msra.gmra.mxu0 %vm599_vm4, %v878_v44 }
 0x4db   : > { %1732 = vmatpush3.bf16.msra.mxu0 %v1012_v46  ;;  %1733 = vmatprep.mubr.msk.bf16.mxu0 %vm1878_vm1, %v1877_v31  ;;  %v1167_v46 = vsub.s32 2, %v2025_v37 }
 0x4dc   : > { %1745 = vmatprep.subr.bf16.mxu0 %v1877_v31 }
 0x4e2   : > { %1734 = vmatmul.mubr.msk.bf16.vlgmr.msra.gmra.mxu0 %vm599_vm4, %v1010_v50  ;;  %v1168_v50 = vrot.slane %v2029_v39, %v1167_v46 }
 0x4e3   : > { %1749 = vmatprep.mubr.msk.bf16.mxu0 %vm1878_vm1, %v1877_v31  ;;  %1746 = vmatpush3.bf16.msra.mxu0 %v1815_v38 }
 0x4e4   : > { %1747 = vmatprep.subr.bf16.mxu0 %v1877_v31 }
 0x55d   : > { %v663_v51 = vpop.f32.mrf.mxu0 }
 0x55e   : > { %670 = vst.msk [vmem:[#allocation3] sm:$0xff] %vm551_vm3, %v663_v51  ;;  %v1173_v51 = vsub.s32 3, %v2025_v37 }
 0x55f   : > { %v1699_v52 = vpop.f32.mrf.mxu0 }
 0x561   : > { %v666_v53 = vpop.f32.mrf.mxu0 }
 0x562   : > { %671 = vst.msk [vmem:[#allocation3 + $0x8] sm:$0xff] %vm551_vm3, %v666_v53 }
 0x563   : > { %v1700_v54 = vpop.f32.mrf.mxu0 }
 0x592   : > { %v787_v55 = vpop.f32.mrf.mxu0 }
 0x593   : > { %796 = vrot.lane.b32.xlu1 %v787_v55, %s1890_s20  ;;  %v1174_v55 = vrot.slane %v2029_v39, %v1173_v51 }
 0x594   : > { %v1711_v56 = vpop.f32.mrf.mxu0 }
 0x596   : > { %v790_v57 = vpop.f32.mrf.mxu0 }
 0x597   : > { %798 = vrot.lane.b32.xlu0 %v790_v57, %s1890_s20 }
 0x598   : > { %v1712_v58 = vpop.f32.mrf.mxu0 }
 0x59a   : > { %v919_v59 = vpop.f32.mrf.mxu0 }
 0x59b   : > { %928 = vrot.lane.b32.xlu1 %v919_v59, %s1891_s27 }
 0x59c   : > { %v1723_v61 = vpop.f32.mrf.mxu0 }
 0x59d   : > { %v1818_v61 = vld [vmem:[%s1980_s29 + $0x10] sm:$0xff]  }
 0x59e   : > { %v922_v63 = vpop.f32.mrf.mxu0 }
 0x59f   : > { %930 = vrot.lane.b32.xlu0 %v922_v63, %s1891_s27  ;;  %v1820_v63 = vld [vmem:[%s1980_s29] sm:$0xff]  }
 0x5a0   : > { %v1724_v0 = vpop.f32.mrf.mxu0 }
 0x5a1   : > { %v1184_v0 = vsub.s32 4, %v2025_v37 }
 0x5a2   : > { %v1051_v1 = vpop.f32.mrf.mxu0 }
 0x5a3   : > { %1060 = vrot.lane.b32.xlu1 %v1051_v1, %s1892_s28  ;;  %v1185_v1 = vrot.slane %v2029_v39, %v1184_v0 }
 0x5a4   : > { %v1735_v2 = vpop.f32.mrf.mxu0 }
 0x5a6   : > { %v1054_v3 = vpop.f32.mrf.mxu0 }
 0x5a7   : > { %1062 = vrot.lane.b32.xlu0 %v1054_v3, %s1892_s28 }
 0x5a8   : > { %v1736_v4 = vpop.f32.mrf.mxu0 }
 0x605   : > { %v797_v5 = vpop.permute.xlu1 %796 }
 0x606   : > { %803 = vst.msk [vmem:[#allocation3] sm:$0xff] %vm802_vm5, %v797_v5 }
 0x609   : > { %v799_v6 = vpop.permute.xlu0 %798 }
 0x60a   : > { %804 = vst.msk [vmem:[#allocation3 + $0x8] sm:$0xff] %vm802_vm5, %v799_v6 }
 0x60d   : > { %v929_v7 = vpop.permute.xlu1 %928 }
 0x60e   : > { %935 = vst.msk [vmem:[#allocation3] sm:$0xff] %vm934_vm6, %v929_v7 }
 0x611   : > { %v931_v8 = vpop.permute.xlu0 %930 }
 0x612   : > { %936 = vst.msk [vmem:[#allocation3 + $0x8] sm:$0xff] %vm934_vm6, %v931_v8 }
 0x615   : > { %v1061_v9 = vpop.permute.xlu1 %1060 }
 0x616   : > { %1067 = vst.msk [vmem:[#allocation3] sm:$0xff] %vm1066_vm7, %v1061_v9 }
 0x619   : > { %v1063_v10 = vpop.permute.xlu0 %1062 }
 0x61a   : > { %1068 = vst.msk [vmem:[#allocation3 + $0x8] sm:$0xff] %vm1066_vm7, %v1063_v10 }
 0x61d   : > { %v1069_v11 = vld [vmem:[#allocation3] sm:$0xff] }
 0x621   : > { %v1070_v12 = vld [vmem:[#allocation3 + $0x8] sm:$0xff] }
 0x622   : > { %v1071_v13 = vpack.c.bf16 %v1070_v12, %v1069_v11 }
 0x624   : > { %1742 = vmatmul.mubr.msk.bf16.vlgmr.msra.gmra.mxu1 %vm497_vm2, %v1071_v13 }
 0x625   : > { %1761 = vmatprep.mubr.msk.bf16.mxu1 %vm1878_vm1, %v1877_v31  ;;  %1754 = vmatpush3.bf16.msra.mxu1 %v1817_v60 }
 0x626   : > { %1755 = vmatprep.subr.bf16.mxu1 %v1877_v31 }
 0x629   : > { %1756 = vmatpush3.bf16.msra.mxu1 %v1818_v61 }
 0x62a   : > { %1757 = vmatprep.subr.bf16.mxu1 %v1877_v31 }
 0x62d   : > { %1758 = vmatpush3.bf16.msra.mxu1 %v1819_v62 }
 0x62e   : > { %1759 = vmatprep.subr.bf16.mxu1 %v1877_v31 }
 0x631   : > { %1760 = vmatpush3.bf16.msra.mxu1 %v1820_v63 }
 0x6e4   : > { %v1129_v16 = vpop.f32.mrf.mxu1 }
 0x6e5   : > { %v1130_v17 = vadd.f32 %v1129_v16, %v1079_v15 }
 0x6e6   : > { %v1743_v18 = vpop.f32.mrf.mxu1 }
 0x6e7   : > { %v1136_v19 = vadd.f32 %v1130_v17, %v2012_v33  ;;  %v1263_v18 = vsub.s32 5, %v2025_v37 }
 0x6e8   : > { %v1132_v20 = vpop.f32.mrf.mxu1 }
 0x6e9   : > { %v1133_v21 = vadd.f32 %v1132_v20, %v1079_v15  ;;  %v1138_v22 = vsel %vm497_vm2, %v1136_v19, 0.0 }
 0x6ea   : > { %1139 = vadd.xlane.f32.xlu1 %v1138_v22  ;;  %v1744_v23 = vpop.f32.mrf.mxu1 }
 0x6eb   : > { %v1137_v49 = vadd.f32 %v1133_v21, %v2014_v34  ;;  %v1816_v34 = vld [vmem:[%s1975_s26] sm:$0xff]  }
 0x6ec   : > { %1748 = vmatpush3.bf16.msra.mxu0 %v1816_v34 }
 0x6ed   : > { %v1141_v24 = vsel %vm497_vm2, %v1137_v49, 0.0 }
 0x6ee   : > { %1142 = vadd.xlane.f32.xlu0 %v1141_v24 }
 0x773   : > { %v1140_v25 = vpop.xlane.xlu1 %1139 }
 0x774   : > { %v1145_v26 = vmul.f32 0.03125, %v1140_v25 }
 0x776   : > { %v1147_v27 = vsub.f32 %v1136_v19, %v1145_v26  ;;  %v1264_v19 = vrot.slane %v2029_v39, %v1263_v18 }
 0x777   : > { %v1143_v28 = vpop.xlane.xlu0 %1142 }
 0x778   : > { %v1146_v29 = vmul.f32 0.03125, %v1143_v28  ;;  %v1149_v30 = vmul.f32 %v1147_v27, %v1147_v27 }
 0x77a   : > { %v1148_v33 = vsub.f32 %v1137_v49, %v1146_v29  ;;  %v1151_v32 = vsel %vm497_vm2, %v1149_v30, 0.0 }
 0x77b   : > { %1152 = vadd.xlane.f32.xlu0 %v1151_v32 }
 0x77c   : > { %v1150_v35 = vmul.f32 %v1148_v33, %v1148_v33 }
 0x77e   : > { %v1154_v36 = vsel %vm497_vm2, %v1150_v35, 0.0 }
 0x77f   : > { %1155 = vadd.xlane.f32.xlu1 %v1154_v36 }
 0x804   : > { %v1153_v40 = vpop.xlane.xlu0 %1152 }
 0x805   : > { %v1157_v41 = vmul.f32 0.03125, %v1153_v40 }
 0x807   : > { %v1159_v42 = vadd.f32 1e-12, %v1157_v41 }
 0x808   : > { %v1156_v43 = vpop.xlane.xlu1 %1155 }
 0x809   : > { %1853 = vrsqrt.f32 %v1159_v42  ;;  %v1158_v44 = vmul.f32 0.03125, %v1156_v43 }
 0x80b   : > { %v1160_v45 = vadd.f32 1e-12, %v1158_v44 }
 0x80d   : > { %1855 = vrsqrt.f32 %v1160_v45 }
 0x816   : > { %v1854_v47 = vpop.eup %1853 }
 0x817   : > { %v1163_v48 = vmul.f32 %v1854_v47, %v1147_v27 }
 0x819   : > { %v1169_v54 = vmul.f32 %v1168_v50, %v1163_v48  ;;  %v1364_v48 = vsub.s32 6, %v2025_v37 }
 0x81a   : > { %v1856_v52 = vpop.eup %1855 }
 0x81b   : > { %v1164_v53 = vmul.f32 %v1856_v52, %v1148_v33  ;;  %v1175_v57 = vadd.f32 %v1174_v55, %v1169_v54  ;;  %v1365_v51 = vrot.slane %v2029_v39, %v1364_v48 }
 0x81d   : > { %v1170_v56 = vmul.f32 %v1168_v50, %v1164_v53  ;;  %v1370_v50 = vsub.s32 7, %v2025_v37 }
 0x81f   : > { %v1176_v58 = vadd.f32 %v1174_v55, %v1170_v56  ;;  %v1371_v53 = vrot.slane %v2029_v39, %v1370_v50 }
 0x821   : > { %v1177_v59 = vpack.c.bf16 %v1176_v58, %v1175_v57 }
 0x823   : > { %1750 = vmatmul.mubr.msk.bf16.vlgmr.msra.gmra.mxu0 %vm497_vm2, %v1177_v59 }
 0x8e3   : > { %v1235_v2 = vpop.f32.mrf.mxu0 }
 0x8e4   : > { %v1236_v3 = vadd.f32 %v1235_v2, %v1185_v1 }
 0x8e5   : > { %v1751_v4 = vpop.f32.mrf.mxu0 }
 0x8e6   : > { %v1244_v5 = vmul.f32 0.70710677, %v1236_v3  ;;  %v1242_v31 = vmul.f32 0.5, %v1236_v3 }
 0x8e7   : > { %v1238_v6 = vpop.f32.mrf.mxu0 }
 0x8e8   : > { %1857 = verf.f32 %v1244_v5  ;;  %v1239_v7 = vadd.f32 %v1238_v6, %v1185_v1 }
 0x8e9   : > { %v1752_v8 = vpop.f32.mrf.mxu0 }
 0x8ea   : > { %v1245_v9 = vmul.f32 0.70710677, %v1239_v7  ;;  %v1243_v13 = vmul.f32 0.5, %v1239_v7 }
 0x8ec   : > { %1859 = verf.f32 %v1245_v9 }
 0x8f5   : > { %v1858_v10 = vpop.eup %1857 }
 0x8f6   : > { %v1248_v11 = vadd.f32 1.0, %v1858_v10 }
 0x8f8   : > { %v1250_v15 = vmul.f32 %v1248_v11, %v1242_v31 }
 0x8f9   : > { %v1860_v12 = vpop.eup %1859 }
 0x8fa   : > { %v1249_v14 = vadd.f32 1.0, %v1860_v12 }
 0x8fc   : > { %v1251_v16 = vmul.f32 %v1249_v14, %v1243_v13 }
 0x8fe   : > { %v1252_v17 = vpack.c.bf16 %v1251_v16, %v1250_v15 }
 0x900   : > { %1762 = vmatmul.mubr.msk.bf16.vlgmr.msra.gmra.mxu1 %vm1289_vm8, %v1252_v17 }
 0x9c0   : > { %v1327_v20 = vpop.f32.mrf.mxu1 }
 0x9c1   : > { %v1328_v21 = vadd.f32 %v1327_v20, %v1264_v19 }
 0x9c2   : > { %v1763_v22 = vpop.f32.mrf.mxu1 }
 0x9c3   : > { %v1334_v23 = vadd.f32 %v1328_v21, %v1175_v57 }
 0x9c4   : > { %v1330_v49 = vpop.f32.mrf.mxu1 }
 0x9c5   : > { %v1331_v24 = vadd.f32 %v1330_v49, %v1264_v19  ;;  %v1336_v25 = vsel %vm497_vm2, %v1334_v23, 0.0 }
 0x9c6   : > { %1337 = vadd.xlane.f32.xlu0 %v1336_v25  ;;  %v1764_v26 = vpop.f32.mrf.mxu1 }
 0x9c7   : > { %v1335_v27 = vadd.f32 %v1331_v24, %v1176_v58 }
 0x9c9   : > { %v1339_v28 = vsel %vm497_vm2, %v1335_v27, 0.0 }
 0x9ca   : > { %1340 = vadd.xlane.f32.xlu1 %v1339_v28 }
 0xa4f   : > { %v1338_v29 = vpop.xlane.xlu0 %1337 }
 0xa50   : > { %v1342_v30 = vmul.f32 0.03125, %v1338_v29 }
 0xa52   : > { %v1344_v33 = vsub.f32 %v1334_v23, %v1342_v30 }
 0xa53   : > { %v1341_v32 = vpop.xlane.xlu1 %1340 }
 0xa54   : > { %v1343_v35 = vmul.f32 0.03125, %v1341_v32  ;;  %v1346_v36 = vmul.f32 %v1344_v33, %v1344_v33 }
 0xa56   : > { %v1345_v38 = vsub.f32 %v1335_v27, %v1343_v35  ;;  %v1348_v34 = vsel %vm497_vm2, %v1346_v36, 0.0 }
 0xa57   : > { %1349 = vadd.xlane.f32.xlu0 %v1348_v34 }
 0xa58   : > { %v1347_v40 = vmul.f32 %v1345_v38, %v1345_v38 }
 0xa5a   : > { %v1351_v41 = vsel %vm497_vm2, %v1347_v40, 0.0 }
 0xa5b   : > { %1352 = vadd.xlane.f32.xlu1 %v1351_v41 }
 0xae0   : > { %v1350_v42 = vpop.xlane.xlu0 %1349 }
 0xae1   : > { %v1354_v43 = vmul.f32 0.03125, %v1350_v42 }
 0xae3   : > { %v1356_v44 = vadd.f32 1e-12, %v1354_v43 }
 0xae4   : > { %v1353_v45 = vpop.xlane.xlu1 %1352 }
 0xae5   : > { %1861 = vrsqrt.f32 %v1356_v44  ;;  %v1355_v46 = vmul.f32 0.03125, %v1353_v45 }
 0xae7   : > { %v1357_v47 = vadd.f32 1e-12, %v1355_v46 }
 0xae9   : > { %1863 = vrsqrt.f32 %v1357_v47 }
 0xaf2   : > { %v1862_v52 = vpop.eup %1861 }
 0xaf3   : > { %v1360_v54 = vmul.f32 %v1862_v52, %v1344_v33 }
 0xaf5   : > { %v1366_v55 = vmul.f32 %v1365_v51, %v1360_v54 }
 0xaf6   : > { %v1864_v56 = vpop.eup %1863 }
 0xaf7   : > { %v1372_v57 = vadd.f32 %v1371_v53, %v1366_v55  ;;  %v1361_v58 = vmul.f32 %v1864_v56, %v1345_v38 }
 0xaf9   : > { %1374 = vst.msk [vmem:[#allocation2] sm:$0xff] %vm497_vm2, %v1372_v57  ;;  %v1367_v59 = vmul.f32 %v1365_v51, %v1361_v58  ;;  %1379 = sbr.rel (%p1630_p5) target bundleno = 3226 (0xc9a), region = 68 }
 0xafb   : > { %v1373_v60 = vadd.f32 %v1371_v53, %v1367_v59 }
 0xafd   : > { %1375 = vst.msk [vmem:[#allocation2 + $0x8] sm:$0xff] %vm497_vm2, %v1373_v60 }
 0xafe   : > { %v1865_v37 = vld [vmem:[%s2192_s8 + $0x8] sm:$0xff]   ;;  %v1893_v61 = vmov 0.0   ;;  %v1866_v39 = vld [vmem:[%s2192_s8] sm:$0xff]   ;;  %vm1894_vm9 = vmmov 0   ;;  %v1380_v62 = vpack.c.bf16 %v1373_v60, %v1372_v57 }
 0xaff   : > { %1765 = vmatprep.subr.bf16.mxu0 %v1893_v61  ;;  %1773 = vmatprep.subr.bf16.mxu1 %v1893_v61  ;;  %v1867_v63 = vld [vmem:[%s2193_s9 + $0x8] sm:$0xff]   ;;  %v1868_v0 = vld [vmem:[%s2193_s9] sm:$0xff]  }
 0xb00   : > { %1766 = vmatpush3.bf16.msra.mxu0 %v1865_v37  ;;  %1769 = vmatprep.mubr.msk.bf16.mxu0 %vm1894_vm9, %v1893_v61  ;;  %v1631_v1 = vld [vmem:[%s2186_s2 + $0x2] ss:$0 sm:$0xff]  ;;  %v1635_v11 = vld [vmem:[%s2186_s2 + $0x3] ss:$0 sm:$0xff] }
 0xb01   : > { %1767 = vmatprep.subr.bf16.mxu0 %v1893_v61  ;;  %1777 = vmatprep.mubr.msk.bf16.mxu1 %vm1894_vm9, %v1893_v61 }
 0xb02   : > { %1774 = vmatpush3.bf16.msra.mxu1 %v1867_v63 }
 0xb03   : > { %1775 = vmatprep.subr.bf16.mxu1 %v1893_v61 }
 0xb04   : > { %1768 = vmatpush3.bf16.msra.mxu0 %v1866_v39 }
 0xb06   : > { %1776 = vmatpush3.bf16.msra.mxu1 %v1868_v0 }
 0xb07   : > { %1770 = vmatmul.mubr.msk.bf16.vlgmr.msra.gmra.mxu0 %vm497_vm2, %v1380_v62 }
 0xbc7   : > { %v1439_v2 = vpop.f32.mrf.mxu0 }
 0xbc8   : > { %v1440_v4 = vadd.f32 %v1631_v1, %v1439_v2 }
 0xbc9   : > { %v1771_v3 = vpop.f32.mrf.mxu0 }
 0xbca   : > { %v1446_v8 = vmax.f32 %v1440_v4, 0.0 }
 0xbcb   : > { %v1442_v5 = vpop.f32.mrf.mxu0 }
 0xbcc   : > { %v1443_v6 = vadd.f32 %v1631_v1, %v1442_v5 }
 0xbcd   : > { %v1772_v7 = vpop.f32.mrf.mxu0 }
 0xbce   : > { %v1447_v9 = vmax.f32 %v1443_v6, 0.0 }
 0xbd0   : > { %v1448_v10 = vpack.c.bf16 %v1447_v9, %v1446_v8 }
 0xbd2   : > { %1778 = vmatmul.mubr.msk.bf16.vlgmr.msra.gmra.mxu1 %vm497_vm2, %v1448_v10 }
 0xc92   : > { %v1507_v12 = vpop.f32.mrf.mxu1 }
 0xc93   : > { %v1508_v31 = vadd.f32 %v1635_v11, %v1507_v12 }
 0xc94   : > { %v1779_v13 = vpop.f32.mrf.mxu1 }
 0xc95   : > { %1514 = vst [vmem:[%s2194_s10] sm:$0xff] %v1508_v31 }
 0xc96   : > { %v1510_v14 = vpop.f32.mrf.mxu1 }
 0xc97   : > { %v1511_v15 = vadd.f32 %v1635_v11, %v1510_v14 }
 0xc98   : > { %v1780_v16 = vpop.f32.mrf.mxu1 }
 0xc99   : > { %1515 = vst [vmem:[%s2194_s10 + $0x8] sm:$0xff] %v1511_v15 }
 0xc9a PF: > { %s20_s13 = sadd.s32 1, %s1875_s13  }
 0xc9b   : > { %p17_p6 = scmp.ge.s32.totalorder %s20_s13, 4  }
 0xc9d   :  { %19 = sbr.rel (!%p17_p6) target bundleno = 1 (0x1), region = 106 }

</bundles_post_ra>
